<compile_context>
chip_gen: v7x
topology: tpu7x:2x2x1
jax: 0.10.0
libtpu: 0.0.40
codegen_flags: <defaults>
</compile_context>

<pallas_src>
import functools
import math

import jax
import jax.numpy as jnp
import numpy as np
from jax.experimental import pallas as pl
from jax.experimental.pallas import tpu as pltpu

_EPS = 1e-7
_EXP_CLAMP = 40.0          # guards f32 overflow in exp(); same in kernel & ref
_STRIDES = (32.0, 16.0, 8.0)
_TARGET_SUBLANES = 48      # ~6K rows per grid step (48 sublane-rows * 128 lanes)


# ----------------------------------------------------------------------------
# Math helpers (kernel side).
# ----------------------------------------------------------------------------
def _recip_fast(x):
    # EUP approximate reciprocal (the EUP slot is otherwise the binding unit).
    return pl.reciprocal(x, approx=True)


def _atan(x, recip):
    """Cephes atanf (jnp.arctan has no Mosaic lowering); single reciprocal."""
    ax = jnp.abs(x)
    big = ax > 2.414213562373095                      # tan(3*pi/8)
    mid = jnp.logical_and(ax > 0.4142135623730951, jnp.logical_not(big))
    num = jnp.where(big, -1.0, jnp.where(mid, ax - 1.0, ax))
    den = jnp.where(big, ax, jnp.where(mid, ax + 1.0, 1.0))
    xr = num * recip(den)
    yoff = jnp.where(big, math.pi / 2.0, jnp.where(mid, math.pi / 4.0, 0.0))
    z = xr * xr
    poly = (((8.05374449538e-2 * z - 1.38776856032e-1) * z
             + 1.99777106478e-1) * z - 3.33329491539e-1) * z * xr + xr
    r = yoff + poly
    return jnp.where(x < 0.0, -r, r)


def _bce_with_logits(x, t):
    # BCEWithLogitsLoss(pos_weight=1), element-wise, numerically stable.
    return jnp.maximum(x, 0.0) - x * t + jnp.log(1.0 + jnp.exp(-jnp.abs(x)))


def _ciou(px, py, pw, ph, tx, ty, tw, th, recip):
    """Ultralytics-style CIoU on midpoint boxes; EUP-minimised formulation."""
    b1x1, b1x2 = px - pw * 0.5, px + pw * 0.5
    b1y1, b1y2 = py - ph * 0.5, py + ph * 0.5
    b2x1, b2x2 = tx - tw * 0.5, tx + tw * 0.5
    b2y1, b2y2 = ty - th * 0.5, ty + th * 0.5
    iw = jnp.maximum(jnp.minimum(b1x2, b2x2) - jnp.maximum(b1x1, b2x1), 0.0)
    ih = jnp.maximum(jnp.minimum(b1y2, b2y2) - jnp.maximum(b1y1, b2y1), 0.0)
    inter = iw * ih
    union = pw * ph + tw * th - inter + _EPS
    cw = jnp.maximum(b1x2, b2x2) - jnp.minimum(b1x1, b2x1)
    ch = jnp.maximum(b1y2, b2y2) - jnp.minimum(b1y1, b2y1)
    c2 = cw * cw + ch * ch + _EPS
    rho2 = ((b2x1 + b2x2 - b1x1 - b1x2) ** 2
            + (b2y1 + b2y2 - b1y1 - b1y2) ** 2) * 0.25
    # iou = inter/union and rho2/c2 share one reciprocal of (union*c2).
    inv_uc = recip(union * c2)
    iou = inter * (c2 * inv_uc)
    dist = rho2 * (union * inv_uc)
    # atan(tw/th) - atan(pw/ph) == atan((tw*ph - pw*th)/(th*ph + tw*pw)):
    # exact for positive ratios, one atan + one reciprocal.
    num = tw * ph - pw * th
    den = th * ph + tw * pw
    dat = _atan(num * recip(den), recip)
    v = (4.0 / (math.pi ** 2)) * dat * dat
    alpha = v * recip(v - iou + (1.0 + _EPS))
    return iou - (dist + v * alpha)


# ----------------------------------------------------------------------------
# Fused Pallas kernel: one grid step = one (F, r_tile, 128) tile that belongs
# to exactly one scale; per-scale sums accumulate into a tiny SMEM output.
# ----------------------------------------------------------------------------
def _yolo_fused_kernel(p_ref, t_ref, out_ref, *,
                       r_tile, num_anchors, num_classes, n_scales,
                       first_step, valid_end, anchors_wh):
    f32 = jnp.float32
    step = pl.program_id(0)
    tile_rows = r_tile * 128

    @pl.when(step == 0)
    def _init():
        for idx in range(n_scales * 4):
            out_ref[idx] = f32(0.0)

    # --- which scale owns this tile (static step ranges) ---------------------
    in_scale = [jnp.logical_and(step >= first_step[l], step < first_step[l + 1])
                for l in range(n_scales)]

    v_end = jnp.int32(valid_end[0])
    for l in range(1, n_scales):
        v_end = jnp.where(in_scale[l], jnp.int32(valid_end[l]), v_end)

    # --- per-row masks / anchor slots rebuilt from iotas (no HBM helpers) ----
    i_io = jax.lax.broadcasted_iota(jnp.int32, (r_tile, 128), 0)
    j_io = jax.lax.broadcasted_iota(jnp.int32, (r_tile, 128), 1)
    ridx = step * tile_rows + i_io * 128 + j_io
    valid = (ridx < v_end).astype(f32)

    # Anchor slot of each row is row % A.  tile_rows % A == 0 and every scale
    # segment starts on a tile boundary, so the pattern is tile-periodic.  The
    # operands are tiny ints, so an exact float "mod" avoids vector integer rem.
    off = ((128 % num_anchors) * i_io + j_io).astype(f32)
    aidx = off - jnp.floor(off * (1.0 / num_anchors)) * f32(num_anchors)

    def dense_anchor(vals):           # vals: tuple of A python floats
        out = jnp.full((r_tile, 128), vals[num_anchors - 1], f32)
        for k in range(num_anchors - 2, -1, -1):
            out = jnp.where(aidx == f32(k), f32(vals[k]), out)
        return out

    aw = dense_anchor(tuple(anchors_wh[0][k][0] for k in range(num_anchors)))
    ah = dense_anchor(tuple(anchors_wh[0][k][1] for k in range(num_anchors)))
    for l in range(1, n_scales):
        aw_l = dense_anchor(tuple(anchors_wh[l][k][0] for k in range(num_anchors)))
        ah_l = dense_anchor(tuple(anchors_wh[l][k][1] for k in range(num_anchors)))
        aw = jnp.where(in_scale[l], aw_l, aw)
        ah = jnp.where(in_scale[l], ah_l, ah)

    recip = _recip_fast

    # --- dense (r_tile, 128) feature tiles (upcast in-kernel) ---------------
    px = p_ref[0].astype(f32)
    py = p_ref[1].astype(f32)
    tx = t_ref[0].astype(f32)
    ty = t_ref[1].astype(f32)
    tobj_t = t_ref[4].astype(f32)

    maskb = tobj_t == 1.0
    maskf = maskb.astype(f32)

    # pbox[..., 2:4] = exp(pred) * anchors.  The guard keeps masked / padded
    # rows from injecting inf/NaN; the clamp only matters for logits where the
    # torch reference overflows anyway.
    pw = jnp.where(maskb,
                   jnp.exp(jnp.minimum(p_ref[2].astype(f32), _EXP_CLAMP)) * aw, 1.0)
    ph = jnp.where(maskb,
                   jnp.exp(jnp.minimum(p_ref[3].astype(f32), _EXP_CLAMP)) * ah, 1.0)
    tw = jnp.where(maskb, t_ref[2].astype(f32), 1.0)
    th = jnp.where(maskb, t_ref[3].astype(f32), 1.0)

    ciou = _ciou(px, py, pw, ph, tx, ty, tw, th, recip)

    box = (1.0 - ciou) * maskf
    tobj = jnp.where(maskb, jnp.maximum(ciou, 0.0), 0.0)        # iou.clamp(0)
    obj = _bce_with_logits(p_ref[4].astype(f32), tobj) * valid

    # Class BCE reduced over the class axis inside the step (no (C, .) scratch).
    cls_row = jnp.zeros((r_tile, 128), f32)
    for c in range(num_classes):
        cls_row = cls_row + _bce_with_logits(p_ref[5 + c].astype(f32),
                                             t_ref[5 + c].astype(f32))
    cls_row = cls_row * maskf

    s_box = jnp.sum(box)
    s_cnt = jnp.sum(maskf)
    s_cls = jnp.sum(cls_row)
    s_obj = jnp.sum(obj)

    for l in range(n_scales):
        @pl.when(in_scale[l])
        def _acc(l=l):
            base = l * 4
            out_ref[base + 0] = out_ref[base + 0] + s_box
            out_ref[base + 1] = out_ref[base + 1] + s_cnt
            out_ref[base + 2] = out_ref[base + 2] + s_cls
            out_ref[base + 3] = out_ref[base + 3] + s_obj


# ----------------------------------------------------------------------------
# Wrapper glue.
# ----------------------------------------------------------------------------
def _choose_r_tile(num_anchors, max_rows):
    """Sublane-rows per grid step: multiple of 8 AND r_tile*128 % A == 0."""
    g = math.gcd(128, num_anchors)
    q = num_anchors // g
    unit = (8 * q) // math.gcd(8, q)               # lcm(8, q)
    r = max(unit, (_TARGET_SUBLANES // unit) * unit)
    need = -(-max_rows // 128)                     # sublane rows of biggest scale
    need = -(-need // unit) * unit
    return max(unit, min(r, need))


def _pack_scales(tensors, tile_rows):
    """Flatten each scale to rows, pad to a tile boundary, concat, and lay out
    as (F, R, 128) in a single XLA layout pass (rows ride the lane axis)."""
    f = tensors[0].shape[-1]
    parts, seg_start, n_rows = [], [], []
    row = 0
    for x in tensors:
        n = int(np.prod(x.shape[:-1]))
        x2 = x.reshape(n, f)
        n_pad = -(-n // tile_rows) * tile_rows
        if n_pad != n:
            x2 = jnp.pad(x2, ((0, n_pad - n), (0, 0)))
        parts.append(x2)
        seg_start.append(row)
        n_rows.append(n)
        row += n_pad
    full = parts[0] if len(parts) == 1 else jnp.concatenate(parts, axis=0)
    total = full.shape[0]
    x3 = full.reshape(total // 128, 128, f).transpose(2, 0, 1)   # (F, R, 128)
    return x3, seg_start, n_rows


def _combine(sums, n_rows, num_classes):
    """Per-scale sums -> the four loss terms (mirrors the torch forward)."""
    box_loss = jnp.zeros((1,), jnp.float32)
    obj_loss = jnp.zeros((1,), jnp.float32)
    cls_loss = jnp.zeros((1,), jnp.float32)
    for l in range(len(n_rows)):
        s_box, s_cnt, s_cls, s_obj = sums[l, 0], sums[l, 1], sums[l, 2], sums[l, 3]
        has = s_cnt > 0.0
        box_loss = box_loss + jnp.where(has, s_box / jnp.maximum(s_cnt, 1.0), 0.0)
        cls_loss = cls_loss + jnp.where(
            has, s_cls / jnp.maximum(s_cnt * num_classes, 1.0), 0.0)
        obj_loss = obj_loss + s_obj / n_rows[l]
    box_loss = box_loss * 0.05
    obj_loss = obj_loss * 1.0
    cls_loss = cls_loss * 0.5
    total = box_loss + obj_loss + cls_loss
    return [total, box_loss, obj_loss, cls_loss]


def make_yolo_loss(anchors, strides=_STRIDES):
    """Mirror of YOLOLoss.__init__: anchors are fixed module parameters and are
    baked into the kernel as constants (no anchor tensors streamed from HBM)."""
    anchors_np = np.asarray(anchors, dtype=np.float32)      # (n_scales, A, 2)

    def loss_fn(predictions, targets):
        n_scales = len(predictions)
        num_anchors = predictions[0].shape[3]
        num_feat = predictions[0].shape[-1]
        num_classes = num_feat - 5
        rows_per_scale = [int(np.prod(p.shape[:-1])) for p in predictions]

        r_tile = _choose_r_tile(num_anchors, max(rows_per_scale))
        tile_rows = r_tile * 128

        p3, seg_start, n_rows = _pack_scales(list(predictions), tile_rows)
        t3, _, _ = _pack_scales(list(targets), tile_rows)
        total_steps = p3.shape[1] // r_tile
        first_step = tuple(s // tile_rows for s in seg_start) + (total_steps,)
        valid_end = tuple(seg_start[l] + n_rows[l] for l in range(n_scales))
        anchors_wh = tuple(
            tuple((float(anchors_np[l, k, 0] / strides[l]),
                   float(anchors_np[l, k, 1] / strides[l]))
                  for k in range(num_anchors))
            for l in range(n_scales))

        kernel = functools.partial(
            _yolo_fused_kernel,
            r_tile=r_tile, num_anchors=num_anchors, num_classes=num_classes,
            n_scales=n_scales, first_step=first_step, valid_end=valid_end,
            anchors_wh=anchors_wh)

        sums_flat = pl.pallas_call(
            kernel,
            out_shape=jax.ShapeDtypeStruct((n_scales * 4,), jnp.float32),
            grid_spec=pltpu.PrefetchScalarGridSpec(
                num_scalar_prefetch=0,
                grid=(total_steps,),
                in_specs=[
                    pl.BlockSpec((num_feat, r_tile, 128), lambda i: (0, i, 0)),
                    pl.BlockSpec((num_feat, r_tile, 128), lambda i: (0, i, 0)),
                ],
                out_specs=pl.BlockSpec(memory_space=pltpu.MemorySpace.SMEM)),
            compiler_params=pltpu.CompilerParams(
                # SMEM accumulators carry across steps -> sequential axis.
                dimension_semantics=("arbitrary",),
                vmem_limit_bytes=32 * 1024 * 1024),
        )(p3, t3)

        sums = sums_flat.reshape(n_scales, 4)
        return _combine(sums, n_rows, num_classes)

    return loss_fn


def yolo_loss_pallas(predictions, targets, anchors):
    return make_yolo_loss(anchors)(predictions, targets)


# ----------------------------------------------------------------------------
# Pure-JAX reference (classic 2-atan CIoU, exact divides) for correctness.
# ----------------------------------------------------------------------------
def _ref_layer_sums(p, t, anc):
    p = p.astype(jnp.float32)
    t = t.astype(jnp.float32)
    maskb = t[..., 4] == 1.0
    maskf = maskb.astype(jnp.float32)
    aw, ah = anc[:, 0], anc[:, 1]
    px, py = p[..., 0], p[..., 1]
    pw = jnp.where(maskb, jnp.exp(jnp.minimum(p[..., 2], _EXP_CLAMP)) * aw, 1.0)
    ph = jnp.where(maskb, jnp.exp(jnp.minimum(p[..., 3], _EXP_CLAMP)) * ah, 1.0)
    tx, ty = t[..., 0], t[..., 1]
    tw = jnp.where(maskb, t[..., 2], 1.0)
    th = jnp.where(maskb, t[..., 3], 1.0)

    b1x1, b1x2 = px - pw * 0.5, px + pw * 0.5
    b1y1, b1y2 = py - ph * 0.5, py + ph * 0.5
    b2x1, b2x2 = tx - tw * 0.5, tx + tw * 0.5
    b2y1, b2y2 = ty - th * 0.5, ty + th * 0.5
    iw = jnp.maximum(jnp.minimum(b1x2, b2x2) - jnp.maximum(b1x1, b2x1), 0.0)
    ih = jnp.maximum(jnp.minimum(b1y2, b2y2) - jnp.maximum(b1y1, b2y1), 0.0)
    inter = iw * ih
    union = pw * ph + tw * th - inter + _EPS
    iou = inter / union
    cw = jnp.maximum(b1x2, b2x2) - jnp.minimum(b1x1, b2x1)
    ch = jnp.maximum(b1y2, b2y2) - jnp.minimum(b1y1, b2y1)
    c2 = cw * cw + ch * ch + _EPS
    rho2 = ((b2x1 + b2x2 - b1x1 - b1x2) ** 2
            + (b2y1 + b2y2 - b1y1 - b1y2) ** 2) * 0.25
    v = (4.0 / math.pi ** 2) * (jnp.arctan(tw / th) - jnp.arctan(pw / ph)) ** 2
    alpha = v / (v - iou + (1.0 + _EPS))
    ciou = iou - (rho2 / c2 + v * alpha)

    box = jnp.sum((1.0 - ciou) * maskf)
    cnt = jnp.sum(maskf)
    cls_ = jnp.sum(_bce_with_logits(p[..., 5:], t[..., 5:]) * maskf[..., None])
    tobj = jnp.where(maskb, jnp.maximum(ciou, 0.0), 0.0)
    obj = jnp.sum(_bce_with_logits(p[..., 4], tobj))
    return jnp.stack([box, cnt, cls_, obj])


def yolo_loss_reference(predictions, targets, anchors, strides=_STRIDES):
    anchors = jnp.asarray(anchors, jnp.float32)
    n_rows = [int(np.prod(p.shape[:-1])) for p in predictions]
    num_classes = predictions[0].shape[-1] - 5
    sums = jnp.stack([
        _ref_layer_sums(predictions[l], targets[l], anchors[l] / strides[l])
        for l in range(len(predictions))])
    return _combine(sums, n_rows, num_classes)


# ----------------------------------------------------------------------------
if __name__ == "__main__":
    key = jax.random.PRNGKey(0)
    B, A, C = 2, 3, 3
    F = 5 + C
    sizes = [4, 8, 16]   # 3 scales (strides 32 / 16 / 8 on a 128px image)

    # Standard YOLOv3 anchors, shape (3 scales, A, 2).
    anchors = jnp.array(
        [[[116.0, 90.0], [156.0, 198.0], [373.0, 326.0]],
         [[30.0, 61.0], [62.0, 45.0], [59.0, 119.0]],
         [[10.0, 13.0], [16.0, 30.0], [33.0, 23.0]]], dtype=jnp.float32)

    preds, targs = [], []
    for s in sizes:
        key, k1, k2, k3, k4, k5 = jax.random.split(key, 6)
        preds.append(jax.random.normal(k1, (B, s, s, A, F), jnp.float32))
        txy = jax.random.uniform(k2, (B, s, s, A, 2), minval=0.0, maxval=float(s))
        twh = jax.random.uniform(k3, (B, s, s, A, 2), minval=0.5, maxval=4.0)
        tobj = (jax.random.uniform(k4, (B, s, s, A, 1)) < 0.3).astype(jnp.float32)
        tcls = (jax.random.uniform(k5, (B, s, s, A, C)) < 0.5).astype(jnp.float32)
        targs.append(jnp.concatenate([txy, twh, tobj, tcls], axis=-1))

    loss_fn = make_yolo_loss(anchors)
    out = loss_fn(preds, targs)
    out = [jax.block_until_ready(o) for o in out]

    ref = yolo_loss_reference(preds, targs, anchors)
    for got, want in zip(out, ref):
        # slightly loose tolerance: kernel uses EUP approximate reciprocals.
        np.testing.assert_allclose(np.asarray(got), np.asarray(want),
                                   rtol=2e-3, atol=2e-4)

    print("KERNEL_OK")
</pallas_src>

<mosaic_0001>
module attributes {stable_mosaic.version = 11 : i64} {
  func.func @_yolo_fused_kernel(%arg0: i32, %arg1: memref<8x24x128xf32, #tpu.memory_space<vmem>>, %arg2: memref<8x24x128xf32, #tpu.memory_space<vmem>>, %arg3: memref<12xf32, #tpu.memory_space<smem>>) attributes {dimension_semantics = [#tpu.dimension_semantics<arbitrary>], iteration_bounds = array<i64: 3>, scalar_prefetch = 0 : i64, scratch_operands = 0 : i64, tpu.core_type = #tpu.core_type<tc>, window_params = [{transform_indices = @transform_0, window_bounds = array<i64: 8, 24, 128>}, {transform_indices = @transform_1, window_bounds = array<i64: 8, 24, 128>}, {transform_indices = @transform_2, window_bounds = array<i64: 12>}]} {
    %c0_i32 = arith.constant 0 : i32
    %0 = arith.cmpi eq, %arg0, %c0_i32 : i32
    %1 = arith.extui %0 : i1 to i32
    %c0_i32_0 = arith.constant 0 : i32
    %2 = arith.cmpi ne, %1, %c0_i32_0 : i32
    scf.if %2 {
      %cst_137 = arith.constant 0.000000e+00 : f32
      %c0_138 = arith.constant 0 : index
      %361 = memref.load %arg3[%c0_138] : memref<12xf32, #tpu.memory_space<smem>>
      memref.store %cst_137, %arg3[%c0_138] : memref<12xf32, #tpu.memory_space<smem>>
      %cst_139 = arith.constant 0.000000e+00 : f32
      %c1_140 = arith.constant 1 : index
      %362 = memref.load %arg3[%c1_140] : memref<12xf32, #tpu.memory_space<smem>>
      memref.store %cst_139, %arg3[%c1_140] : memref<12xf32, #tpu.memory_space<smem>>
      %cst_141 = arith.constant 0.000000e+00 : f32
      %c2_142 = arith.constant 2 : index
      %363 = memref.load %arg3[%c2_142] : memref<12xf32, #tpu.memory_space<smem>>
      memref.store %cst_141, %arg3[%c2_142] : memref<12xf32, #tpu.memory_space<smem>>
      %cst_143 = arith.constant 0.000000e+00 : f32
      %c3_144 = arith.constant 3 : index
      %364 = memref.load %arg3[%c3_144] : memref<12xf32, #tpu.memory_space<smem>>
      memref.store %cst_143, %arg3[%c3_144] : memref<12xf32, #tpu.memory_space<smem>>
      %cst_145 = arith.constant 0.000000e+00 : f32
      %c4_146 = arith.constant 4 : index
      %365 = memref.load %arg3[%c4_146] : memref<12xf32, #tpu.memory_space<smem>>
      memref.store %cst_145, %arg3[%c4_146] : memref<12xf32, #tpu.memory_space<smem>>
      %cst_147 = arith.constant 0.000000e+00 : f32
      %c5_148 = arith.constant 5 : index
      %366 = memref.load %arg3[%c5_148] : memref<12xf32, #tpu.memory_space<smem>>
      memref.store %cst_147, %arg3[%c5_148] : memref<12xf32, #tpu.memory_space<smem>>
      %cst_149 = arith.constant 0.000000e+00 : f32
      %c6_150 = arith.constant 6 : index
      %367 = memref.load %arg3[%c6_150] : memref<12xf32, #tpu.memory_space<smem>>
      memref.store %cst_149, %arg3[%c6_150] : memref<12xf32, #tpu.memory_space<smem>>
      %cst_151 = arith.constant 0.000000e+00 : f32
      %c7_152 = arith.constant 7 : index
      %368 = memref.load %arg3[%c7_152] : memref<12xf32, #tpu.memory_space<smem>>
      memref.store %cst_151, %arg3[%c7_152] : memref<12xf32, #tpu.memory_space<smem>>
      %cst_153 = arith.constant 0.000000e+00 : f32
      %c8 = arith.constant 8 : index
      %369 = memref.load %arg3[%c8] : memref<12xf32, #tpu.memory_space<smem>>
      memref.store %cst_153, %arg3[%c8] : memref<12xf32, #tpu.memory_space<smem>>
      %cst_154 = arith.constant 0.000000e+00 : f32
      %c9 = arith.constant 9 : index
      %370 = memref.load %arg3[%c9] : memref<12xf32, #tpu.memory_space<smem>>
      memref.store %cst_154, %arg3[%c9] : memref<12xf32, #tpu.memory_space<smem>>
      %cst_155 = arith.constant 0.000000e+00 : f32
      %c10 = arith.constant 10 : index
      %371 = memref.load %arg3[%c10] : memref<12xf32, #tpu.memory_space<smem>>
      memref.store %cst_155, %arg3[%c10] : memref<12xf32, #tpu.memory_space<smem>>
      %cst_156 = arith.constant 0.000000e+00 : f32
      %c11 = arith.constant 11 : index
      %372 = memref.load %arg3[%c11] : memref<12xf32, #tpu.memory_space<smem>>
      memref.store %cst_156, %arg3[%c11] : memref<12xf32, #tpu.memory_space<smem>>
    } else {
    }
    %c0_i32_1 = arith.constant 0 : i32
    %3 = arith.cmpi sge, %arg0, %c0_i32_1 : i32
    %c1_i32 = arith.constant 1 : i32
    %4 = arith.cmpi slt, %arg0, %c1_i32 : i32
    %5 = arith.andi %3, %4 : i1
    %c1_i32_2 = arith.constant 1 : i32
    %6 = arith.cmpi sge, %arg0, %c1_i32_2 : i32
    %c2_i32 = arith.constant 2 : i32
    %7 = arith.cmpi slt, %arg0, %c2_i32 : i32
    %8 = arith.andi %6, %7 : i1
    %c2_i32_3 = arith.constant 2 : i32
    %9 = arith.cmpi sge, %arg0, %c2_i32_3 : i32
    %c3_i32 = arith.constant 3 : i32
    %10 = arith.cmpi slt, %arg0, %c3_i32 : i32
    %11 = arith.andi %9, %10 : i1
    %c3456_i32 = arith.constant 3456 : i32
    %c96_i32 = arith.constant 96 : i32
    %12 = arith.select %8, %c3456_i32, %c96_i32 : i32
    %c7680_i32 = arith.constant 7680 : i32
    %13 = arith.select %11, %c7680_i32, %12 : i32
    %14 = tpu.iota {dimensions = array<i32: 0>} : vector<24x128xi32>
    %15 = tpu.iota {dimensions = array<i32: 1>} : vector<24x128xi32>
    %c3072_i32 = arith.constant 3072 : i32
    %16 = arith.muli %arg0, %c3072_i32 : i32
    %c128_i32 = arith.constant 128 : i32
    %17 = vector.broadcast %c128_i32 : i32 to vector<24x128xi32>
    %18 = arith.muli %14, %17 : vector<24x128xi32>
    %19 = vector.broadcast %16 : i32 to vector<24x128xi32>
    %20 = arith.addi %19, %18 : vector<24x128xi32>
    %21 = arith.addi %20, %15 : vector<24x128xi32>
    %22 = vector.broadcast %13 : i32 to vector<24x128xi32>
    %23 = arith.cmpi slt, %21, %22 : vector<24x128xi32>
    %24 = arith.extui %23 : vector<24x128xi1> to vector<24x128xi32>
    %25 = arith.sitofp %24 : vector<24x128xi32> to vector<24x128xf32>
    %c2_i32_4 = arith.constant 2 : i32
    %26 = vector.broadcast %c2_i32_4 : i32 to vector<24x128xi32>
    %27 = arith.muli %26, %14 : vector<24x128xi32>
    %28 = arith.addi %27, %15 : vector<24x128xi32>
    %29 = arith.sitofp %28 : vector<24x128xi32> to vector<24x128xf32>
    %cst = arith.constant 0.333333343 : f32
    %30 = vector.broadcast %cst : f32 to vector<24x128xf32>
    %31 = arith.mulf %29, %30 : vector<24x128xf32>
    %32 = math.floor %31 : vector<24x128xf32>
    %cst_5 = arith.constant 3.000000e+00 : f32
    %33 = vector.broadcast %cst_5 : f32 to vector<24x128xf32>
    %34 = arith.mulf %32, %33 : vector<24x128xf32>
    %35 = arith.subf %29, %34 : vector<24x128xf32>
    %cst_6 = arith.constant 11.65625 : f32
    %36 = vector.broadcast %cst_6 : f32 to vector<24x128xf32>
    %cst_7 = arith.constant 1.000000e+00 : f32
    %37 = vector.broadcast %cst_7 : f32 to vector<24x128xf32>
    %38 = arith.cmpf oeq, %35, %37 : vector<24x128xf32>
    %cst_8 = arith.constant 4.875000e+00 : f32
    %39 = vector.broadcast %cst_8 : f32 to vector<24x128xf32>
    %40 = arith.select %38, %39, %36 : vector<24x128xi1>, vector<24x128xf32>
    %cst_9 = arith.constant 0.000000e+00 : f32
    %41 = vector.broadcast %cst_9 : f32 to vector<24x128xf32>
    %42 = arith.cmpf oeq, %35, %41 : vector<24x128xf32>
    %cst_10 = arith.constant 3.625000e+00 : f32
    %43 = vector.broadcast %cst_10 : f32 to vector<24x128xf32>
    %44 = arith.select %42, %43, %40 : vector<24x128xi1>, vector<24x128xf32>
    %cst_11 = arith.constant 1.018750e+01 : f32
    %45 = vector.broadcast %cst_11 : f32 to vector<24x128xf32>
    %cst_12 = arith.constant 1.000000e+00 : f32
    %46 = vector.broadcast %cst_12 : f32 to vector<24x128xf32>
    %47 = arith.cmpf oeq, %35, %46 : vector<24x128xf32>
    %cst_13 = arith.constant 6.187500e+00 : f32
    %48 = vector.broadcast %cst_13 : f32 to vector<24x128xf32>
    %49 = arith.select %47, %48, %45 : vector<24x128xi1>, vector<24x128xf32>
    %cst_14 = arith.constant 0.000000e+00 : f32
    %50 = vector.broadcast %cst_14 : f32 to vector<24x128xf32>
    %51 = arith.cmpf oeq, %35, %50 : vector<24x128xf32>
    %cst_15 = arith.constant 2.812500e+00 : f32
    %52 = vector.broadcast %cst_15 : f32 to vector<24x128xf32>
    %53 = arith.select %51, %52, %49 : vector<24x128xi1>, vector<24x128xf32>
    %cst_16 = arith.constant 3.687500e+00 : f32
    %54 = vector.broadcast %cst_16 : f32 to vector<24x128xf32>
    %cst_17 = arith.constant 1.000000e+00 : f32
    %55 = vector.broadcast %cst_17 : f32 to vector<24x128xf32>
    %56 = arith.cmpf oeq, %35, %55 : vector<24x128xf32>
    %cst_18 = arith.constant 3.875000e+00 : f32
    %57 = vector.broadcast %cst_18 : f32 to vector<24x128xf32>
    %58 = arith.select %56, %57, %54 : vector<24x128xi1>, vector<24x128xf32>
    %cst_19 = arith.constant 0.000000e+00 : f32
    %59 = vector.broadcast %cst_19 : f32 to vector<24x128xf32>
    %60 = arith.cmpf oeq, %35, %59 : vector<24x128xf32>
    %cst_20 = arith.constant 1.875000e+00 : f32
    %61 = vector.broadcast %cst_20 : f32 to vector<24x128xf32>
    %62 = arith.select %60, %61, %58 : vector<24x128xi1>, vector<24x128xf32>
    %cst_21 = arith.constant 7.437500e+00 : f32
    %63 = vector.broadcast %cst_21 : f32 to vector<24x128xf32>
    %cst_22 = arith.constant 1.000000e+00 : f32
    %64 = vector.broadcast %cst_22 : f32 to vector<24x128xf32>
    %65 = arith.cmpf oeq, %35, %64 : vector<24x128xf32>
    %cst_23 = arith.constant 2.812500e+00 : f32
    %66 = vector.broadcast %cst_23 : f32 to vector<24x128xf32>
    %67 = arith.select %65, %66, %63 : vector<24x128xi1>, vector<24x128xf32>
    %cst_24 = arith.constant 0.000000e+00 : f32
    %68 = vector.broadcast %cst_24 : f32 to vector<24x128xf32>
    %69 = arith.cmpf oeq, %35, %68 : vector<24x128xf32>
    %cst_25 = arith.constant 3.812500e+00 : f32
    %70 = vector.broadcast %cst_25 : f32 to vector<24x128xf32>
    %71 = arith.select %69, %70, %67 : vector<24x128xi1>, vector<24x128xf32>
    %72 = arith.select %8, %62, %44 : vector<24x128xf32>
    %73 = arith.select %8, %71, %53 : vector<24x128xf32>
    %cst_26 = arith.constant 4.125000e+00 : f32
    %74 = vector.broadcast %cst_26 : f32 to vector<24x128xf32>
    %cst_27 = arith.constant 1.000000e+00 : f32
    %75 = vector.broadcast %cst_27 : f32 to vector<24x128xf32>
    %76 = arith.cmpf oeq, %35, %75 : vector<24x128xf32>
    %cst_28 = arith.constant 2.000000e+00 : f32
    %77 = vector.broadcast %cst_28 : f32 to vector<24x128xf32>
    %78 = arith.select %76, %77, %74 : vector<24x128xi1>, vector<24x128xf32>
    %cst_29 = arith.constant 0.000000e+00 : f32
    %79 = vector.broadcast %cst_29 : f32 to vector<24x128xf32>
    %80 = arith.cmpf oeq, %35, %79 : vector<24x128xf32>
    %cst_30 = arith.constant 1.250000e+00 : f32
    %81 = vector.broadcast %cst_30 : f32 to vector<24x128xf32>
    %82 = arith.select %80, %81, %78 : vector<24x128xi1>, vector<24x128xf32>
    %cst_31 = arith.constant 2.875000e+00 : f32
    %83 = vector.broadcast %cst_31 : f32 to vector<24x128xf32>
    %cst_32 = arith.constant 1.000000e+00 : f32
    %84 = vector.broadcast %cst_32 : f32 to vector<24x128xf32>
    %85 = arith.cmpf oeq, %35, %84 : vector<24x128xf32>
    %cst_33 = arith.constant 3.750000e+00 : f32
    %86 = vector.broadcast %cst_33 : f32 to vector<24x128xf32>
    %87 = arith.select %85, %86, %83 : vector<24x128xi1>, vector<24x128xf32>
    %cst_34 = arith.constant 0.000000e+00 : f32
    %88 = vector.broadcast %cst_34 : f32 to vector<24x128xf32>
    %89 = arith.cmpf oeq, %35, %88 : vector<24x128xf32>
    %cst_35 = arith.constant 1.625000e+00 : f32
    %90 = vector.broadcast %cst_35 : f32 to vector<24x128xf32>
    %91 = arith.select %89, %90, %87 : vector<24x128xi1>, vector<24x128xf32>
    %92 = arith.select %11, %82, %72 : vector<24x128xf32>
    %93 = arith.select %11, %91, %73 : vector<24x128xf32>
    %c0 = arith.constant 0 : index
    %c0_36 = arith.constant 0 : index
    %c0_37 = arith.constant 0 : index
    %94 = vector.load %arg1[%c0, %c0_36, %c0_37] : memref<8x24x128xf32, #tpu.memory_space<vmem>>, vector<1x24x128xf32>
    %95 = vector.shape_cast %94 : vector<1x24x128xf32> to vector<24x128xf32>
    %c1 = arith.constant 1 : index
    %c0_38 = arith.constant 0 : index
    %c0_39 = arith.constant 0 : index
    %96 = vector.load %arg1[%c1, %c0_38, %c0_39] : memref<8x24x128xf32, #tpu.memory_space<vmem>>, vector<1x24x128xf32>
    %97 = vector.shape_cast %96 : vector<1x24x128xf32> to vector<24x128xf32>
    %c0_40 = arith.constant 0 : index
    %c0_41 = arith.constant 0 : index
    %c0_42 = arith.constant 0 : index
    %98 = vector.load %arg2[%c0_40, %c0_41, %c0_42] : memref<8x24x128xf32, #tpu.memory_space<vmem>>, vector<1x24x128xf32>
    %99 = vector.shape_cast %98 : vector<1x24x128xf32> to vector<24x128xf32>
    %c1_43 = arith.constant 1 : index
    %c0_44 = arith.constant 0 : index
    %c0_45 = arith.constant 0 : index
    %100 = vector.load %arg2[%c1_43, %c0_44, %c0_45] : memref<8x24x128xf32, #tpu.memory_space<vmem>>, vector<1x24x128xf32>
    %101 = vector.shape_cast %100 : vector<1x24x128xf32> to vector<24x128xf32>
    %c4 = arith.constant 4 : index
    %c0_46 = arith.constant 0 : index
    %c0_47 = arith.constant 0 : index
    %102 = vector.load %arg2[%c4, %c0_46, %c0_47] : memref<8x24x128xf32, #tpu.memory_space<vmem>>, vector<1x24x128xf32>
    %103 = vector.shape_cast %102 : vector<1x24x128xf32> to vector<24x128xf32>
    %cst_48 = arith.constant 1.000000e+00 : f32
    %104 = vector.broadcast %cst_48 : f32 to vector<24x128xf32>
    %105 = arith.cmpf oeq, %103, %104 : vector<24x128xf32>
    %106 = arith.extui %105 : vector<24x128xi1> to vector<24x128xi32>
    %107 = arith.sitofp %106 : vector<24x128xi32> to vector<24x128xf32>
    %c2 = arith.constant 2 : index
    %c0_49 = arith.constant 0 : index
    %c0_50 = arith.constant 0 : index
    %108 = vector.load %arg1[%c2, %c0_49, %c0_50] : memref<8x24x128xf32, #tpu.memory_space<vmem>>, vector<1x24x128xf32>
    %109 = vector.shape_cast %108 : vector<1x24x128xf32> to vector<24x128xf32>
    %cst_51 = arith.constant 4.000000e+01 : f32
    %110 = vector.broadcast %cst_51 : f32 to vector<24x128xf32>
    %111 = arith.minimumf %109, %110 : vector<24x128xf32>
    %112 = math.exp %111 : vector<24x128xf32>
    %113 = arith.mulf %112, %92 : vector<24x128xf32>
    %cst_52 = arith.constant 1.000000e+00 : f32
    %114 = vector.broadcast %cst_52 : f32 to vector<24x128xf32>
    %115 = arith.select %105, %113, %114 : vector<24x128xi1>, vector<24x128xf32>
    %c3 = arith.constant 3 : index
    %c0_53 = arith.constant 0 : index
    %c0_54 = arith.constant 0 : index
    %116 = vector.load %arg1[%c3, %c0_53, %c0_54] : memref<8x24x128xf32, #tpu.memory_space<vmem>>, vector<1x24x128xf32>
    %117 = vector.shape_cast %116 : vector<1x24x128xf32> to vector<24x128xf32>
    %cst_55 = arith.constant 4.000000e+01 : f32
    %118 = vector.broadcast %cst_55 : f32 to vector<24x128xf32>
    %119 = arith.minimumf %117, %118 : vector<24x128xf32>
    %120 = math.exp %119 : vector<24x128xf32>
    %121 = arith.mulf %120, %93 : vector<24x128xf32>
    %cst_56 = arith.constant 1.000000e+00 : f32
    %122 = vector.broadcast %cst_56 : f32 to vector<24x128xf32>
    %123 = arith.select %105, %121, %122 : vector<24x128xi1>, vector<24x128xf32>
    %c2_57 = arith.constant 2 : index
    %c0_58 = arith.constant 0 : index
    %c0_59 = arith.constant 0 : index
    %124 = vector.load %arg2[%c2_57, %c0_58, %c0_59] : memref<8x24x128xf32, #tpu.memory_space<vmem>>, vector<1x24x128xf32>
    %125 = vector.shape_cast %124 : vector<1x24x128xf32> to vector<24x128xf32>
    %cst_60 = arith.constant 1.000000e+00 : f32
    %126 = vector.broadcast %cst_60 : f32 to vector<24x128xf32>
    %127 = arith.select %105, %125, %126 : vector<24x128xi1>, vector<24x128xf32>
    %c3_61 = arith.constant 3 : index
    %c0_62 = arith.constant 0 : index
    %c0_63 = arith.constant 0 : index
    %128 = vector.load %arg2[%c3_61, %c0_62, %c0_63] : memref<8x24x128xf32, #tpu.memory_space<vmem>>, vector<1x24x128xf32>
    %129 = vector.shape_cast %128 : vector<1x24x128xf32> to vector<24x128xf32>
    %cst_64 = arith.constant 1.000000e+00 : f32
    %130 = vector.broadcast %cst_64 : f32 to vector<24x128xf32>
    %131 = arith.select %105, %129, %130 : vector<24x128xi1>, vector<24x128xf32>
    %cst_65 = arith.constant 5.000000e-01 : f32
    %132 = vector.broadcast %cst_65 : f32 to vector<24x128xf32>
    %133 = arith.mulf %115, %132 : vector<24x128xf32>
    %134 = arith.subf %95, %133 : vector<24x128xf32>
    %cst_66 = arith.constant 5.000000e-01 : f32
    %135 = vector.broadcast %cst_66 : f32 to vector<24x128xf32>
    %136 = arith.mulf %115, %135 : vector<24x128xf32>
    %137 = arith.addf %95, %136 : vector<24x128xf32>
    %cst_67 = arith.constant 5.000000e-01 : f32
    %138 = vector.broadcast %cst_67 : f32 to vector<24x128xf32>
    %139 = arith.mulf %123, %138 : vector<24x128xf32>
    %140 = arith.subf %97, %139 : vector<24x128xf32>
    %cst_68 = arith.constant 5.000000e-01 : f32
    %141 = vector.broadcast %cst_68 : f32 to vector<24x128xf32>
    %142 = arith.mulf %123, %141 : vector<24x128xf32>
    %143 = arith.addf %97, %142 : vector<24x128xf32>
    %cst_69 = arith.constant 5.000000e-01 : f32
    %144 = vector.broadcast %cst_69 : f32 to vector<24x128xf32>
    %145 = arith.mulf %127, %144 : vector<24x128xf32>
    %146 = arith.subf %99, %145 : vector<24x128xf32>
    %cst_70 = arith.constant 5.000000e-01 : f32
    %147 = vector.broadcast %cst_70 : f32 to vector<24x128xf32>
    %148 = arith.mulf %127, %147 : vector<24x128xf32>
    %149 = arith.addf %99, %148 : vector<24x128xf32>
    %cst_71 = arith.constant 5.000000e-01 : f32
    %150 = vector.broadcast %cst_71 : f32 to vector<24x128xf32>
    %151 = arith.mulf %131, %150 : vector<24x128xf32>
    %152 = arith.subf %101, %151 : vector<24x128xf32>
    %cst_72 = arith.constant 5.000000e-01 : f32
    %153 = vector.broadcast %cst_72 : f32 to vector<24x128xf32>
    %154 = arith.mulf %131, %153 : vector<24x128xf32>
    %155 = arith.addf %101, %154 : vector<24x128xf32>
    %156 = arith.minimumf %137, %149 : vector<24x128xf32>
    %157 = arith.maximumf %134, %146 : vector<24x128xf32>
    %158 = arith.subf %156, %157 : vector<24x128xf32>
    %cst_73 = arith.constant 0.000000e+00 : f32
    %159 = vector.broadcast %cst_73 : f32 to vector<24x128xf32>
    %160 = arith.maximumf %158, %159 : vector<24x128xf32>
    %161 = arith.minimumf %143, %155 : vector<24x128xf32>
    %162 = arith.maximumf %140, %152 : vector<24x128xf32>
    %163 = arith.subf %161, %162 : vector<24x128xf32>
    %cst_74 = arith.constant 0.000000e+00 : f32
    %164 = vector.broadcast %cst_74 : f32 to vector<24x128xf32>
    %165 = arith.maximumf %163, %164 : vector<24x128xf32>
    %166 = arith.mulf %160, %165 : vector<24x128xf32>
    %167 = arith.mulf %115, %123 : vector<24x128xf32>
    %168 = arith.mulf %127, %131 : vector<24x128xf32>
    %169 = arith.addf %167, %168 : vector<24x128xf32>
    %170 = arith.subf %169, %166 : vector<24x128xf32>
    %cst_75 = arith.constant 1.000000e-07 : f32
    %171 = vector.broadcast %cst_75 : f32 to vector<24x128xf32>
    %172 = arith.addf %170, %171 : vector<24x128xf32>
    %173 = arith.maximumf %137, %149 : vector<24x128xf32>
    %174 = arith.minimumf %134, %146 : vector<24x128xf32>
    %175 = arith.subf %173, %174 : vector<24x128xf32>
    %176 = arith.maximumf %143, %155 : vector<24x128xf32>
    %177 = arith.minimumf %140, %152 : vector<24x128xf32>
    %178 = arith.subf %176, %177 : vector<24x128xf32>
    %179 = arith.mulf %175, %175 : vector<24x128xf32>
    %180 = arith.mulf %178, %178 : vector<24x128xf32>
    %181 = arith.addf %179, %180 : vector<24x128xf32>
    %cst_76 = arith.constant 1.000000e-07 : f32
    %182 = vector.broadcast %cst_76 : f32 to vector<24x128xf32>
    %183 = arith.addf %181, %182 : vector<24x128xf32>
    %184 = arith.addf %146, %149 : vector<24x128xf32>
    %185 = arith.subf %184, %134 : vector<24x128xf32>
    %186 = arith.subf %185, %137 : vector<24x128xf32>
    %187 = arith.mulf %186, %186 : vector<24x128xf32>
    %188 = arith.addf %152, %155 : vector<24x128xf32>
    %189 = arith.subf %188, %140 : vector<24x128xf32>
    %190 = arith.subf %189, %143 : vector<24x128xf32>
    %191 = arith.mulf %190, %190 : vector<24x128xf32>
    %192 = arith.addf %187, %191 : vector<24x128xf32>
    %cst_77 = arith.constant 2.500000e-01 : f32
    %193 = vector.broadcast %cst_77 : f32 to vector<24x128xf32>
    %194 = arith.mulf %192, %193 : vector<24x128xf32>
    %195 = arith.mulf %172, %183 : vector<24x128xf32>
    %196 = tpu.reciprocal %195 {approx = true} : vector<24x128xf32> -> vector<24x128xf32>
    %197 = arith.mulf %183, %196 : vector<24x128xf32>
    %198 = arith.mulf %166, %197 : vector<24x128xf32>
    %199 = arith.mulf %172, %196 : vector<24x128xf32>
    %200 = arith.mulf %194, %199 : vector<24x128xf32>
    %201 = arith.mulf %127, %123 : vector<24x128xf32>
    %202 = arith.mulf %115, %131 : vector<24x128xf32>
    %203 = arith.subf %201, %202 : vector<24x128xf32>
    %204 = arith.mulf %131, %123 : vector<24x128xf32>
    %205 = arith.mulf %127, %115 : vector<24x128xf32>
    %206 = arith.addf %204, %205 : vector<24x128xf32>
    %207 = tpu.reciprocal %206 {approx = true} : vector<24x128xf32> -> vector<24x128xf32>
    %208 = arith.mulf %203, %207 : vector<24x128xf32>
    %209 = math.absf %208 : vector<24x128xf32>
    %cst_78 = arith.constant 2.41421366 : f32
    %210 = vector.broadcast %cst_78 : f32 to vector<24x128xf32>
    %211 = arith.cmpf ogt, %209, %210 : vector<24x128xf32>
    %cst_79 = arith.constant 0.414213568 : f32
    %212 = vector.broadcast %cst_79 : f32 to vector<24x128xf32>
    %213 = arith.cmpf ogt, %209, %212 : vector<24x128xf32>
    %cst_80 = arith.constant dense<true> : vector<24x128xi1>
    %214 = arith.xori %211, %cst_80 : vector<24x128xi1>
    %215 = arith.andi %213, %214 : vector<24x128xi1>
    %cst_81 = arith.constant 1.000000e+00 : f32
    %216 = vector.broadcast %cst_81 : f32 to vector<24x128xf32>
    %217 = arith.subf %209, %216 : vector<24x128xf32>
    %218 = arith.select %215, %217, %209 : vector<24x128xi1>, vector<24x128xf32>
    %cst_82 = arith.constant -1.000000e+00 : f32
    %219 = vector.broadcast %cst_82 : f32 to vector<24x128xf32>
    %220 = arith.select %211, %219, %218 : vector<24x128xi1>, vector<24x128xf32>
    %cst_83 = arith.constant 1.000000e+00 : f32
    %221 = vector.broadcast %cst_83 : f32 to vector<24x128xf32>
    %222 = arith.addf %209, %221 : vector<24x128xf32>
    %cst_84 = arith.constant 1.000000e+00 : f32
    %223 = vector.broadcast %cst_84 : f32 to vector<24x128xf32>
    %224 = arith.select %215, %222, %223 : vector<24x128xi1>, vector<24x128xf32>
    %225 = arith.select %211, %209, %224 : vector<24x128xi1>, vector<24x128xf32>
    %226 = tpu.reciprocal %225 {approx = true} : vector<24x128xf32> -> vector<24x128xf32>
    %227 = arith.mulf %220, %226 : vector<24x128xf32>
    %cst_85 = arith.constant 0.785398185 : f32
    %cst_86 = arith.constant 0.000000e+00 : f32
    %228 = vector.broadcast %cst_85 : f32 to vector<24x128xf32>
    %229 = vector.broadcast %cst_86 : f32 to vector<24x128xf32>
    %230 = arith.select %215, %228, %229 : vector<24x128xi1>, vector<24x128xf32>
    %cst_87 = arith.constant 1.57079637 : f32
    %231 = vector.broadcast %cst_87 : f32 to vector<24x128xf32>
    %232 = arith.select %211, %231, %230 : vector<24x128xi1>, vector<24x128xf32>
    %233 = arith.mulf %227, %227 : vector<24x128xf32>
    %cst_88 = arith.constant 0.0805374458 : f32
    %234 = vector.broadcast %cst_88 : f32 to vector<24x128xf32>
    %235 = arith.mulf %234, %233 : vector<24x128xf32>
    %cst_89 = arith.constant 0.138776854 : f32
    %236 = vector.broadcast %cst_89 : f32 to vector<24x128xf32>
    %237 = arith.subf %235, %236 : vector<24x128xf32>
    %238 = arith.mulf %237, %233 : vector<24x128xf32>
    %cst_90 = arith.constant 0.199777111 : f32
    %239 = vector.broadcast %cst_90 : f32 to vector<24x128xf32>
    %240 = arith.addf %238, %239 : vector<24x128xf32>
    %241 = arith.mulf %240, %233 : vector<24x128xf32>
    %cst_91 = arith.constant 0.333329499 : f32
    %242 = vector.broadcast %cst_91 : f32 to vector<24x128xf32>
    %243 = arith.subf %241, %242 : vector<24x128xf32>
    %244 = arith.mulf %243, %233 : vector<24x128xf32>
    %245 = arith.mulf %244, %227 : vector<24x128xf32>
    %246 = arith.addf %245, %227 : vector<24x128xf32>
    %247 = arith.addf %232, %246 : vector<24x128xf32>
    %cst_92 = arith.constant 0.000000e+00 : f32
    %248 = vector.broadcast %cst_92 : f32 to vector<24x128xf32>
    %249 = arith.cmpf olt, %208, %248 : vector<24x128xf32>
    %cst_93 = arith.constant 0.000000e+00 : f32
    %250 = vector.broadcast %cst_93 : f32 to vector<24x128xf32>
    %251 = arith.subf %250, %247 : vector<24x128xf32>
    %252 = arith.select %249, %251, %247 : vector<24x128xi1>, vector<24x128xf32>
    %cst_94 = arith.constant 0.405284733 : f32
    %253 = vector.broadcast %cst_94 : f32 to vector<24x128xf32>
    %254 = arith.mulf %253, %252 : vector<24x128xf32>
    %255 = arith.mulf %254, %252 : vector<24x128xf32>
    %256 = arith.subf %255, %198 : vector<24x128xf32>
    %cst_95 = arith.constant 1.00000012 : f32
    %257 = vector.broadcast %cst_95 : f32 to vector<24x128xf32>
    %258 = arith.addf %256, %257 : vector<24x128xf32>
    %259 = tpu.reciprocal %258 {approx = true} : vector<24x128xf32> -> vector<24x128xf32>
    %260 = arith.mulf %255, %259 : vector<24x128xf32>
    %261 = arith.mulf %255, %260 : vector<24x128xf32>
    %262 = arith.addf %200, %261 : vector<24x128xf32>
    %263 = arith.subf %198, %262 : vector<24x128xf32>
    %cst_96 = arith.constant 1.000000e+00 : f32
    %264 = vector.broadcast %cst_96 : f32 to vector<24x128xf32>
    %265 = arith.subf %264, %263 : vector<24x128xf32>
    %266 = arith.mulf %265, %107 : vector<24x128xf32>
    %cst_97 = arith.constant 0.000000e+00 : f32
    %267 = vector.broadcast %cst_97 : f32 to vector<24x128xf32>
    %268 = arith.maximumf %263, %267 : vector<24x128xf32>
    %cst_98 = arith.constant 0.000000e+00 : f32
    %269 = vector.broadcast %cst_98 : f32 to vector<24x128xf32>
    %270 = arith.select %105, %268, %269 : vector<24x128xi1>, vector<24x128xf32>
    %c4_99 = arith.constant 4 : index
    %c0_100 = arith.constant 0 : index
    %c0_101 = arith.constant 0 : index
    %271 = vector.load %arg1[%c4_99, %c0_100, %c0_101] : memref<8x24x128xf32, #tpu.memory_space<vmem>>, vector<1x24x128xf32>
    %272 = vector.shape_cast %271 : vector<1x24x128xf32> to vector<24x128xf32>
    %cst_102 = arith.constant 0.000000e+00 : f32
    %273 = vector.broadcast %cst_102 : f32 to vector<24x128xf32>
    %274 = arith.maximumf %272, %273 : vector<24x128xf32>
    %275 = arith.mulf %272, %270 : vector<24x128xf32>
    %276 = arith.subf %274, %275 : vector<24x128xf32>
    %277 = math.absf %272 : vector<24x128xf32>
    %cst_103 = arith.constant 0.000000e+00 : f32
    %278 = vector.broadcast %cst_103 : f32 to vector<24x128xf32>
    %279 = arith.subf %278, %277 : vector<24x128xf32>
    %280 = math.exp %279 : vector<24x128xf32>
    %cst_104 = arith.constant 1.000000e+00 : f32
    %281 = vector.broadcast %cst_104 : f32 to vector<24x128xf32>
    %282 = arith.addf %281, %280 : vector<24x128xf32>
    %283 = math.log %282 : vector<24x128xf32>
    %284 = arith.addf %276, %283 : vector<24x128xf32>
    %285 = arith.mulf %284, %25 : vector<24x128xf32>
    %cst_105 = arith.constant 0.000000e+00 : f32
    %286 = vector.broadcast %cst_105 : f32 to vector<24x128xf32>
    %c5 = arith.constant 5 : index
    %c0_106 = arith.constant 0 : index
    %c0_107 = arith.constant 0 : index
    %287 = vector.load %arg1[%c5, %c0_106, %c0_107] : memref<8x24x128xf32, #tpu.memory_space<vmem>>, vector<1x24x128xf32>
    %288 = vector.shape_cast %287 : vector<1x24x128xf32> to vector<24x128xf32>
    %c5_108 = arith.constant 5 : index
    %c0_109 = arith.constant 0 : index
    %c0_110 = arith.constant 0 : index
    %289 = vector.load %arg2[%c5_108, %c0_109, %c0_110] : memref<8x24x128xf32, #tpu.memory_space<vmem>>, vector<1x24x128xf32>
    %290 = vector.shape_cast %289 : vector<1x24x128xf32> to vector<24x128xf32>
    %cst_111 = arith.constant 0.000000e+00 : f32
    %291 = vector.broadcast %cst_111 : f32 to vector<24x128xf32>
    %292 = arith.maximumf %288, %291 : vector<24x128xf32>
    %293 = arith.mulf %288, %290 : vector<24x128xf32>
    %294 = arith.subf %292, %293 : vector<24x128xf32>
    %295 = math.absf %288 : vector<24x128xf32>
    %cst_112 = arith.constant 0.000000e+00 : f32
    %296 = vector.broadcast %cst_112 : f32 to vector<24x128xf32>
    %297 = arith.subf %296, %295 : vector<24x128xf32>
    %298 = math.exp %297 : vector<24x128xf32>
    %cst_113 = arith.constant 1.000000e+00 : f32
    %299 = vector.broadcast %cst_113 : f32 to vector<24x128xf32>
    %300 = arith.addf %299, %298 : vector<24x128xf32>
    %301 = math.log %300 : vector<24x128xf32>
    %302 = arith.addf %294, %301 : vector<24x128xf32>
    %303 = arith.addf %286, %302 : vector<24x128xf32>
    %c6 = arith.constant 6 : index
    %c0_114 = arith.constant 0 : index
    %c0_115 = arith.constant 0 : index
    %304 = vector.load %arg1[%c6, %c0_114, %c0_115] : memref<8x24x128xf32, #tpu.memory_space<vmem>>, vector<1x24x128xf32>
    %305 = vector.shape_cast %304 : vector<1x24x128xf32> to vector<24x128xf32>
    %c6_116 = arith.constant 6 : index
    %c0_117 = arith.constant 0 : index
    %c0_118 = arith.constant 0 : index
    %306 = vector.load %arg2[%c6_116, %c0_117, %c0_118] : memref<8x24x128xf32, #tpu.memory_space<vmem>>, vector<1x24x128xf32>
    %307 = vector.shape_cast %306 : vector<1x24x128xf32> to vector<24x128xf32>
    %cst_119 = arith.constant 0.000000e+00 : f32
    %308 = vector.broadcast %cst_119 : f32 to vector<24x128xf32>
    %309 = arith.maximumf %305, %308 : vector<24x128xf32>
    %310 = arith.mulf %305, %307 : vector<24x128xf32>
    %311 = arith.subf %309, %310 : vector<24x128xf32>
    %312 = math.absf %305 : vector<24x128xf32>
    %cst_120 = arith.constant 0.000000e+00 : f32
    %313 = vector.broadcast %cst_120 : f32 to vector<24x128xf32>
    %314 = arith.subf %313, %312 : vector<24x128xf32>
    %315 = math.exp %314 : vector<24x128xf32>
    %cst_121 = arith.constant 1.000000e+00 : f32
    %316 = vector.broadcast %cst_121 : f32 to vector<24x128xf32>
    %317 = arith.addf %316, %315 : vector<24x128xf32>
    %318 = math.log %317 : vector<24x128xf32>
    %319 = arith.addf %311, %318 : vector<24x128xf32>
    %320 = arith.addf %303, %319 : vector<24x128xf32>
    %c7 = arith.constant 7 : index
    %c0_122 = arith.constant 0 : index
    %c0_123 = arith.constant 0 : index
    %321 = vector.load %arg1[%c7, %c0_122, %c0_123] : memref<8x24x128xf32, #tpu.memory_space<vmem>>, vector<1x24x128xf32>
    %322 = vector.shape_cast %321 : vector<1x24x128xf32> to vector<24x128xf32>
    %c7_124 = arith.constant 7 : index
    %c0_125 = arith.constant 0 : index
    %c0_126 = arith.constant 0 : index
    %323 = vector.load %arg2[%c7_124, %c0_125, %c0_126] : memref<8x24x128xf32, #tpu.memory_space<vmem>>, vector<1x24x128xf32>
    %324 = vector.shape_cast %323 : vector<1x24x128xf32> to vector<24x128xf32>
    %cst_127 = arith.constant 0.000000e+00 : f32
    %325 = vector.broadcast %cst_127 : f32 to vector<24x128xf32>
    %326 = arith.maximumf %322, %325 : vector<24x128xf32>
    %327 = arith.mulf %322, %324 : vector<24x128xf32>
    %328 = arith.subf %326, %327 : vector<24x128xf32>
    %329 = math.absf %322 : vector<24x128xf32>
    %cst_128 = arith.constant 0.000000e+00 : f32
    %330 = vector.broadcast %cst_128 : f32 to vector<24x128xf32>
    %331 = arith.subf %330, %329 : vector<24x128xf32>
    %332 = math.exp %331 : vector<24x128xf32>
    %cst_129 = arith.constant 1.000000e+00 : f32
    %333 = vector.broadcast %cst_129 : f32 to vector<24x128xf32>
    %334 = arith.addf %333, %332 : vector<24x128xf32>
    %335 = math.log %334 : vector<24x128xf32>
    %336 = arith.addf %328, %335 : vector<24x128xf32>
    %337 = arith.addf %320, %336 : vector<24x128xf32>
    %338 = arith.mulf %337, %107 : vector<24x128xf32>
    %339 = vector.shape_cast %266 : vector<24x128xf32> to vector<1x24x128xf32>
    %cst_130 = arith.constant dense<0.000000e+00> : vector<1xf32>
    %340 = vector.multi_reduction <add>, %339, %cst_130 [1, 2] : vector<1x24x128xf32> to vector<1xf32>
    %341 = vector.shape_cast %340 : vector<1xf32> to vector<1x1x1xf32>
    %342 = vector.extract %341[0, 0, 0] : f32 from vector<1x1x1xf32>
    %343 = vector.shape_cast %107 : vector<24x128xf32> to vector<1x24x128xf32>
    %cst_131 = arith.constant dense<0.000000e+00> : vector<1xf32>
    %344 = vector.multi_reduction <add>, %343, %cst_131 [1, 2] : vector<1x24x128xf32> to vector<1xf32>
    %345 = vector.shape_cast %344 : vector<1xf32> to vector<1x1x1xf32>
    %346 = vector.extract %345[0, 0, 0] : f32 from vector<1x1x1xf32>
    %347 = vector.shape_cast %338 : vector<24x128xf32> to vector<1x24x128xf32>
    %cst_132 = arith.constant dense<0.000000e+00> : vector<1xf32>
    %348 = vector.multi_reduction <add>, %347, %cst_132 [1, 2] : vector<1x24x128xf32> to vector<1xf32>
    %349 = vector.shape_cast %348 : vector<1xf32> to vector<1x1x1xf32>
    %350 = vector.extract %349[0, 0, 0] : f32 from vector<1x1x1xf32>
    %351 = vector.shape_cast %285 : vector<24x128xf32> to vector<1x24x128xf32>
    %cst_133 = arith.constant dense<0.000000e+00> : vector<1xf32>
    %352 = vector.multi_reduction <add>, %351, %cst_133 [1, 2] : vector<1x24x128xf32> to vector<1xf32>
    %353 = vector.shape_cast %352 : vector<1xf32> to vector<1x1x1xf32>
    %354 = vector.extract %353[0, 0, 0] : f32 from vector<1x1x1xf32>
    %355 = arith.extui %5 : i1 to i32
    %c0_i32_134 = arith.constant 0 : i32
    %356 = arith.cmpi ne, %355, %c0_i32_134 : i32
    scf.if %356 {
      %c0_137 = arith.constant 0 : index
      %361 = memref.load %arg3[%c0_137] : memref<12xf32, #tpu.memory_space<smem>>
      %362 = arith.addf %361, %342 : f32
      %c0_138 = arith.constant 0 : index
      %363 = memref.load %arg3[%c0_138] : memref<12xf32, #tpu.memory_space<smem>>
      memref.store %362, %arg3[%c0_138] : memref<12xf32, #tpu.memory_space<smem>>
      %c1_139 = arith.constant 1 : index
      %364 = memref.load %arg3[%c1_139] : memref<12xf32, #tpu.memory_space<smem>>
      %365 = arith.addf %364, %346 : f32
      %c1_140 = arith.constant 1 : index
      %366 = memref.load %arg3[%c1_140] : memref<12xf32, #tpu.memory_space<smem>>
      memref.store %365, %arg3[%c1_140] : memref<12xf32, #tpu.memory_space<smem>>
      %c2_141 = arith.constant 2 : index
      %367 = memref.load %arg3[%c2_141] : memref<12xf32, #tpu.memory_space<smem>>
      %368 = arith.addf %367, %350 : f32
      %c2_142 = arith.constant 2 : index
      %369 = memref.load %arg3[%c2_142] : memref<12xf32, #tpu.memory_space<smem>>
      memref.store %368, %arg3[%c2_142] : memref<12xf32, #tpu.memory_space<smem>>
      %c3_143 = arith.constant 3 : index
      %370 = memref.load %arg3[%c3_143] : memref<12xf32, #tpu.memory_space<smem>>
      %371 = arith.addf %370, %354 : f32
      %c3_144 = arith.constant 3 : index
      %372 = memref.load %arg3[%c3_144] : memref<12xf32, #tpu.memory_space<smem>>
      memref.store %371, %arg3[%c3_144] : memref<12xf32, #tpu.memory_space<smem>>
    } else {
    }
    %357 = arith.extui %8 : i1 to i32
    %c0_i32_135 = arith.constant 0 : i32
    %358 = arith.cmpi ne, %357, %c0_i32_135 : i32
    scf.if %358 {
      %c4_137 = arith.constant 4 : index
      %361 = memref.load %arg3[%c4_137] : memref<12xf32, #tpu.memory_space<smem>>
      %362 = arith.addf %361, %342 : f32
      %c4_138 = arith.constant 4 : index
      %363 = memref.load %arg3[%c4_138] : memref<12xf32, #tpu.memory_space<smem>>
      memref.store %362, %arg3[%c4_138] : memref<12xf32, #tpu.memory_space<smem>>
      %c5_139 = arith.constant 5 : index
      %364 = memref.load %arg3[%c5_139] : memref<12xf32, #tpu.memory_space<smem>>
      %365 = arith.addf %364, %346 : f32
      %c5_140 = arith.constant 5 : index
      %366 = memref.load %arg3[%c5_140] : memref<12xf32, #tpu.memory_space<smem>>
      memref.store %365, %arg3[%c5_140] : memref<12xf32, #tpu.memory_space<smem>>
      %c6_141 = arith.constant 6 : index
      %367 = memref.load %arg3[%c6_141] : memref<12xf32, #tpu.memory_space<smem>>
      %368 = arith.addf %367, %350 : f32
      %c6_142 = arith.constant 6 : index
      %369 = memref.load %arg3[%c6_142] : memref<12xf32, #tpu.memory_space<smem>>
      memref.store %368, %arg3[%c6_142] : memref<12xf32, #tpu.memory_space<smem>>
      %c7_143 = arith.constant 7 : index
      %370 = memref.load %arg3[%c7_143] : memref<12xf32, #tpu.memory_space<smem>>
      %371 = arith.addf %370, %354 : f32
      %c7_144 = arith.constant 7 : index
      %372 = memref.load %arg3[%c7_144] : memref<12xf32, #tpu.memory_space<smem>>
      memref.store %371, %arg3[%c7_144] : memref<12xf32, #tpu.memory_space<smem>>
    } else {
    }
    %359 = arith.extui %11 : i1 to i32
    %c0_i32_136 = arith.constant 0 : i32
    %360 = arith.cmpi ne, %359, %c0_i32_136 : i32
    scf.if %360 {
      %c8 = arith.constant 8 : index
      %361 = memref.load %arg3[%c8] : memref<12xf32, #tpu.memory_space<smem>>
      %362 = arith.addf %361, %342 : f32
      %c8_137 = arith.constant 8 : index
      %363 = memref.load %arg3[%c8_137] : memref<12xf32, #tpu.memory_space<smem>>
      memref.store %362, %arg3[%c8_137] : memref<12xf32, #tpu.memory_space<smem>>
      %c9 = arith.constant 9 : index
      %364 = memref.load %arg3[%c9] : memref<12xf32, #tpu.memory_space<smem>>
      %365 = arith.addf %364, %346 : f32
      %c9_138 = arith.constant 9 : index
      %366 = memref.load %arg3[%c9_138] : memref<12xf32, #tpu.memory_space<smem>>
      memref.store %365, %arg3[%c9_138] : memref<12xf32, #tpu.memory_space<smem>>
      %c10 = arith.constant 10 : index
      %367 = memref.load %arg3[%c10] : memref<12xf32, #tpu.memory_space<smem>>
      %368 = arith.addf %367, %350 : f32
      %c10_139 = arith.constant 10 : index
      %369 = memref.load %arg3[%c10_139] : memref<12xf32, #tpu.memory_space<smem>>
      memref.store %368, %arg3[%c10_139] : memref<12xf32, #tpu.memory_space<smem>>
      %c11 = arith.constant 11 : index
      %370 = memref.load %arg3[%c11] : memref<12xf32, #tpu.memory_space<smem>>
      %371 = arith.addf %370, %354 : f32
      %c11_140 = arith.constant 11 : index
      %372 = memref.load %arg3[%c11_140] : memref<12xf32, #tpu.memory_space<smem>>
      memref.store %371, %arg3[%c11_140] : memref<12xf32, #tpu.memory_space<smem>>
    } else {
    }
    return
  }
  func.func @transform_0(%arg0: i32) -> (i32, i32, i32) {
    %c0_i32 = arith.constant 0 : i32
    %c0_i32_0 = arith.constant 0 : i32
    %c0_i32_1 = arith.constant 0 : i32
    return %c0_i32, %arg0, %c0_i32_0 : i32, i32, i32
  }
  func.func @transform_1(%arg0: i32) -> (i32, i32, i32) {
    %c0_i32 = arith.constant 0 : i32
    %c0_i32_0 = arith.constant 0 : i32
    %c0_i32_1 = arith.constant 0 : i32
    return %c0_i32, %arg0, %c0_i32_0 : i32, i32, i32
  }
  func.func @transform_2(%arg0: i32) -> i32 {
    %c0_i32 = arith.constant 0 : i32
    %c0_i32_0 = arith.constant 0 : i32
    return %c0_i32 : i32
  }
}

</mosaic_0001>

<bundles_post_ra>
// kernel: tpu_custom_call.1
= control target key start
LH: loop header
LB: loop body
LE: loop exit
PB: predicated region body
PF: predicated region fallthrough
CT: control target
= control target key end

     0   :  { %7 = vsyncpa [#allocation3], 0  ;;  %s2452_s0 = inlined_call_operand.hbm [shape: f32[8,72,128], index: 0, kind: input, shape index: {}]   ;;  %s2453_s1 = inlined_call_operand.hbm [shape: f32[8,72,128], index: 1, kind: input, shape index: {}]   ;;  %s2454_s2 = inlined_call_operand.hbm [shape: f32[12], index: 2, kind: output, shape index: {}]  }
   0x1   :  { %9 = vsyncpa [#allocation3 + $0x1], 0 }
   0x2   :  { %10 = vsyncpa [#allocation6], 0 }
   0x3   :  { %12 = vsyncpa [#allocation6 + $0x1], 0 }
   0x4   :  { %13 = vsyncpa [#allocation4], 0  ;;  %s1513_s9 = smov 0   ;;  %s1515_s10 = smov 0  }
   0x5   :  { %s1517_s11 = smov 0   ;;  %s1519_s12 = smov 0  }
   0x6 LB: > { %s1532_s13 = sadd.s32 4294967295, %s1474_s12   ;;  %s1535_s14 = sadd.s32 1, %s1474_s12   ;;  %s1474_s12 = sphi %s1519_s12, %s2536_s12   ;;  %s1470_s11 = sphi %s1517_s11, %s2535_s11   ;;  %s1466_s10 = sphi %s1515_s10, %s2534_s10   ;;  %s1462_s9 = sphi %s1513_s9, %s2533_s9  }
   0x7   : > { %s23_s15 = ssub.s32 %s1474_s12, %s1535_s14  ;;  %s26_s16 = sadd.s32 1, %s1470_s11 }
   0x8   : > { %p24_p0 = scmp.eq.s32.totalorder %s23_s15, 0  ;;  %p33_p1 = scmp.ne.s32.totalorder %s1470_s11, %s1466_s10 }
   0x9   : > { %p34_p2 = scmp.eq.s32.totalorder %s1474_s12, 0  ;;  %p39_p3 = scmp.ne.s32.totalorder %s1466_s10, %s1462_s9 }
   0xa   : > { %s1545_s17 = scalar_select %p24_p0, %s1470_s11, %s26_s16  }
   0xb   : > { %p1547_p4 = por %p34_p2, %p33_p1  ;;  %p40_p5 = scmp.eq.s32.totalorder %s1532_s13, 0 }
   0xc   : > { %p1131_p7 = scmp.ge.s32.totalorder %s1474_s12, 3 }
   0xd   : > { %p1554_p6 = por %p40_p5, %p39_p3 }
   0xe   : > { %106 = sbr.rel (%p1131_p7) target bundleno = 47 (0x2f), region = 16 }
  0x15   : > { %s1560_s20 = sand.u32 1, %s1470_s11   ;;  %s1216_s21 = smul.u32 384, %s1474_s12 }
  0x16   : > { %s1218_s22 = smul.u32 192, %s1560_s20  ;;  %s1476_s23 = smov 1152  }
  0x17   : > { %1230 = sst [smem:[#allocation9]] (%p1547_p4), %s1476_s23  ;;  %s120_s27 = scalar_lea.hbm %s2452_s0, %s1216_s21 }
  0x18   : > { %s1229_s24 = scalar_select %p1547_p4, [#allocation0], [#allocation12] }
  0x19   : > { %s114_s29 = scalar_lea.vmem [#allocation2], %s1218_s22  ;;  %s1477_s3 = smov 384  }
  0x1a   : > { %s125_s28 = sld [smem:[%s1229_s24]]   ;;  %s133_s30 = sshll.u32 %s114_s29, 4  ;;  %s134_s30 = int_to_ptr.vmem [resolvable:$true] %s133_s30 }
  0x1b   : > { %1231 = sst [smem:[#allocation9 + $0x1]] (%p1547_p4), %s1477_s3  ;;  %s1478_s4 = smov 3  }
  0x1c   : > { %1232 = sst [smem:[#allocation9 + $0x2]] (%p1547_p4), %s1478_s4  ;;  %s1479_s5 = smov 128  }
  0x1d   : > { %1233 = sst [smem:[#allocation9 + $0x3]] (%p1547_p4), %s1479_s5  ;;  %s1480_s6 = smov 8  }
  0x1e   : > { %1234 = sst [smem:[#allocation9 + $0x4]] (%p1547_p4), %s1479_s5  ;;  %s111_s9 = scalar_lea.sflag [#allocation3], %s1560_s20 }
  0x1f   : > { %1235 = sst [smem:[#allocation9 + $0x5]] (%p1547_p4), %s1480_s6  ;;  %s1481_s15 = smov [#allocation8]  }
  0x20   : > { %s1133_s7 = sshll.u32 %s125_s28, 26 }
  0x21   : > { %s1134_s8 = sadd.s32 134217728, %s1133_s7 }
  0x22   : > { %1236 = dma.general (%p1547_p4), %s120_s27, 3072, %s134_s30, %s111_s9, %s1481_s15, [#allocation9], %s1134_s8, 0  }
  0x23   : > { %s166_s24 = scalar_lea.hbm %s2453_s1, %s1216_s21  ;;  %s160_s26 = scalar_lea.vmem [#allocation5], %s1218_s22 }
  0x24   : > { %s1237_s25 = scalar_select %p1547_p4, [#allocation0], [#allocation13] }
  0x25   : > { %s179_s28 = sshll.u32 %s160_s26, 4  ;;  %s1482_s3 = smov 1152   ;;  %s180_s28 = int_to_ptr.vmem [resolvable:$true] %s179_s28 }
  0x26   : > { %s171_s29 = sld [smem:[%s1237_s25]]   ;;  %s1483_s27 = smov 384  }
  0x27   : > { %1238 = sst [smem:[#allocation11]] (%p1547_p4), %s1482_s3  ;;  %s1484_s30 = smov 3  }
  0x28   : > { %1239 = sst [smem:[#allocation11 + $0x1]] (%p1547_p4), %s1483_s27  ;;  %s1485_s4 = smov 128  }
  0x29   : > { %1240 = sst [smem:[#allocation11 + $0x2]] (%p1547_p4), %s1484_s30  ;;  %s1486_s22 = smov 8  }
  0x2a   : > { %1241 = sst [smem:[#allocation11 + $0x3]] (%p1547_p4), %s1485_s4  ;;  %s157_s6 = scalar_lea.sflag [#allocation6], %s1560_s20 }
  0x2b   : > { %1242 = sst [smem:[#allocation11 + $0x4]] (%p1547_p4), %s1485_s4  ;;  %s1487_s7 = smov [#allocation10]  }
  0x2c   : > { %s1136_s21 = sshll.u32 %s171_s29, 26  ;;  %1243 = sst [smem:[#allocation11 + $0x5]] (%p1547_p4), %s1486_s22 }
  0x2d   : > { %s1137_s5 = sadd.s32 134217728, %s1136_s21 }
  0x2e   : > { %1244 = dma.general (%p1547_p4), %s166_s24, 3072, %s180_s28, %s157_s6, %s1487_s7, [#allocation11], %s1137_s5, 0  }
  0x2f PF: > { %p1138_p8 = scmp.ge.s32.totalorder %s1474_s12, 1  ;;  %p200_p9 = scmp.lt.s32.totalorder %s1474_s12, 4 }
  0x31   : > { %p201_p10 = pnand %p1138_p8, %p200_p9 }
  0x33   : > { %204 = sbr.rel (%p201_p10) target bundleno = 470 (0x1d6), region = 28 }
  0x3a   : > { %s206_s8 = sand.u32 1, %s1466_s10  }
  0x3b   : > { %s1220_s9 = smul.u32 192, %s206_s8  ;;  %s207_s15 = scalar_lea.sflag [#allocation3], %s206_s8 }
  0x3d   : > { %s1607_s16 = scalar_lea.vmem [#allocation2], %s1220_s9 }
  0x3e   : > { %1449 = dma.done.wait (%p1554_p6), %s207_s15, 3072  }
  0x3f   : > { %1451 = vsyncadd (%p1554_p6), %s207_s15, 4294964224  ;;  %s216_s18 = scalar_lea.sflag [#allocation6], %s206_s8  ;;  %s1613_s20 = scalar_lea.vmem [#allocation5], %s1220_s9 }
  0x40   : > { %1453 = dma.done.wait (%p1554_p6), %s216_s18, 3072  }
  0x41   : > { %1455 = vsyncadd (%p1554_p6), %s216_s18, 4294964224  ;;  %p274_p11 = scmp.ge.s32.totalorder %s1532_s13, 1  ;;  %p275_p12 = scmp.lt.s32.totalorder %s1532_s13, 2  ;;  %v1632_v0 = vld [vmem:[%s1607_s16 + $0x78] sm:$0xff]  ;;  %v1635_v1 = vld [vmem:[%s1607_s16 + $0x80] sm:$0xff]  ;;  %v284_v39 = vlaneseq  ;;  %vm1495_vm14 = vmmov 1  }
  0x42   : > { %p278_p13 = scmp.ge.s32.totalorder %s1532_s13, 2  ;;  %p279_p0 = scmp.lt.s32.totalorder %s1532_s13, 3  ;;  %v1638_v2 = vld [vmem:[%s1607_s16 + $0x88] sm:$0xff]  ;;  %v834_v3 = vand.u32 2147483647, %v1632_v0  ;;  %v1644_v6 = vld [vmem:[%s1607_s16 + $0x90] sm:$0xff] }
  0x43   : > { %p1623_p1 = pnand %p275_p12, %p274_p11  ;;  %v835_v4 = vand.u32 2147483647, %v1635_v1  ;;  %v836_v5 = vand.u32 2147483647, %v1638_v2  ;;  %v1647_v9 = vld [vmem:[%s1607_s16 + $0x98] sm:$0xff]  ;;  %v1650_v11 = vld [vmem:[%s1607_s16 + $0xa0] sm:$0xff] }
  0x44   : > { %p1627_p2 = pnand %p279_p0, %p278_p13  ;;  %v837_v7 = vsub.f32 0.0, %v834_v3  ;;  %v878_v14 = vand.u32 2147483647, %v1644_v6  ;;  %v879_v16 = vand.u32 2147483647, %v1647_v9  ;;  %v1656_v20 = vld [vmem:[%s1607_s16 + $0xa8] sm:$0xff] }
  0x45   : > { %v838_v8 = vsub.f32 0.0, %v835_v4  ;;  %v839_v10 = vsub.f32 0.0, %v836_v5  ;;  %v880_v17 = vand.u32 2147483647, %v1650_v11  ;;  %v1659_v21 = vld [vmem:[%s1607_s16 + $0xb0] sm:$0xff]  ;;  %v1662_v25 = vld [vmem:[%s1607_s16 + $0xb8] sm:$0xff] }
  0x46   : > { %v840_v12 = vmul.f32 1.442695, %v837_v7  ;;  %v881_v18 = vsub.f32 0.0, %v878_v14  ;;  %v882_v19 = vsub.f32 0.0, %v879_v16  ;;  %v922_v27 = vand.u32 2147483647, %v1656_v20 }
  0x47   : > { %v842_v13 = vmul.f32 1.442695, %v838_v8  ;;  %v844_v15 = vmul.f32 1.442695, %v839_v10  ;;  %v883_v22 = vsub.f32 0.0, %v880_v17  ;;  %v1667_v46 = vshrl.u32 %v284_v39, 7 }
  0x48   : > { %1336 = vpow2.f32 %v840_v12  ;;  %v884_v23 = vmul.f32 1.442695, %v881_v18  ;;  %v886_v24 = vmul.f32 1.442695, %v882_v19  ;;  %v923_v28 = vand.u32 2147483647, %v1659_v21 }
  0x49   : > { %1338 = vpow2.f32 %v842_v13  ;;  %v888_v26 = vmul.f32 1.442695, %v883_v22  ;;  %v924_v29 = vand.u32 2147483647, %v1662_v25  ;;  %v925_v30 = vsub.f32 0.0, %v922_v27  ;;  %2482 = vst [vmem:[#allocation17_spill] sm:$0xff] %v1667_v46 }
  0x4a   : > { %1340 = vpow2.f32 %v844_v15  ;;  %v926_v31 = vsub.f32 0.0, %v923_v28  ;;  %v1186_v49 = vld [vmem:[%s1613_s20 + $0x78] sm:$0xff]  ;;  %v1187_v51 = vld [vmem:[%s1613_s20 + $0x80] sm:$0xff]  ;;  %v1188_v52 = vld [vmem:[%s1613_s20 + $0x88] sm:$0xff]  ;;  %v1674_v54 = vadd.s32 8, %v1667_v46  ;;  %v1677_v55 = vadd.s32 16, %v1667_v46 }
  0x4b   : > { %1342 = vpow2.f32 %v884_v23  ;;  %v927_v32 = vsub.f32 0.0, %v924_v29  ;;  %v928_v33 = vmul.f32 1.442695, %v925_v30  ;;  %v1192_v53 = vld [vmem:[%s1613_s20 + $0x90] sm:$0xff]  ;;  %v825_v57 = vmax.f32 %v1632_v0, 0.0  ;;  %v1193_v61 = vld [vmem:[%s1613_s20 + $0x98] sm:$0xff] }
  0x4c   : > { %1344 = vpow2.f32 %v886_v24  ;;  %v930_v34 = vmul.f32 1.442695, %v926_v31  ;;  %2483 = vst [vmem:[#allocation18_spill] sm:$0xff] %v1674_v54  ;;  %2484 = vst [vmem:[#allocation19_spill] sm:$0xff] %v1677_v55  ;;  %v826_v58 = vmax.f32 %v1635_v1, 0.0  ;;  %v827_v59 = vmax.f32 %v1638_v2, 0.0 }
  0x4d   : > { %1346 = vpow2.f32 %v888_v26  ;;  %v932_v36 = vmul.f32 1.442695, %v927_v32  ;;  %v828_v60 = vmul.f32 %v1186_v49, %v1632_v0  ;;  %v1194_v62 = vld [vmem:[%s1613_s20 + $0xa0] sm:$0xff]  ;;  %v829_v3 = vmul.f32 %v1187_v51, %v1635_v1  ;;  %v1198_v19 = vld [vmem:[%s1613_s20 + $0xa8] sm:$0xff]  ;;  %v1199_v27 = vld [vmem:[%s1613_s20 + $0xb0] sm:$0xff]  ;;  %s290_s25 = smul.u32 3072, %s1532_s13 }
  0x4e   : > { %1348 = vpow2.f32 %v928_v33  ;;  %v830_v4 = vmul.f32 %v1188_v52, %v1638_v2  ;;  %v869_v5 = vmax.f32 %v1644_v6, 0.0  ;;  %v870_v10 = vmax.f32 %v1647_v9, 0.0  ;;  %v1200_v33 = vld [vmem:[%s1613_s20 + $0xb8] sm:$0xff]  ;;  %v1708_v49 = vld [vmem:[%s1613_s20 + $0x60] sm:$0xff]  ;;  %s1145_s23 = scalar_select %p1623_p1, 0, 1 }
  0x4f   : > { %1350 = vpow2.f32 %v930_v34  ;;  %v871_v12 = vmax.f32 %v1650_v11, 0.0  ;;  %v872_v13 = vmul.f32 %v1192_v53, %v1644_v6  ;;  %v873_v15 = vmul.f32 %v1193_v61, %v1647_v9  ;;  %2486 = vst [vmem:[#allocation21_spill] sm:$0xff] %v1708_v49  ;;  %v1714_v61 = vld [vmem:[%s1613_s20 + $0x68] sm:$0xff]  ;;  %s1146_s24 = scalar_select %p1627_p2, 0, 1 }
  0x50   : > { %1352 = vpow2.f32 %v932_v36  ;;  %v874_v16 = vmul.f32 %v1194_v62, %v1650_v11  ;;  %v311_v17 = vmul.u32 2, %v1667_v46  ;;  %v1695_v22 = vand.u32 127, %v284_v39  ;;  %2487 = vst [vmem:[#allocation22_spill] sm:$0xff] %v1714_v61  ;;  %s1140_s26 = scalar_select %p1623_p1, 96, 3456 }
  0x51   : > { %v312_v6 = vmul.u32 2, %v1674_v54  ;;  %v313_v23 = vmul.u32 2, %v1677_v55  ;;  %v831_v9 = vsub.f32 %v825_v57, %v828_v60  ;;  %v832_v24 = vsub.f32 %v826_v58, %v829_v3  ;;  %p270_p3 = scmp.ge.s32.totalorder %s1532_s13, 0  ;;  %s1496_s28 = smov 0.0  }
  0x52   : > { %v1337_v35 = vpop.eup %1336  ;;  %2485 = vst [vmem:[#allocation20_spill] sm:$0xff] %v1695_v22  ;;  %v875_v26 = vsub.f32 %v869_v5, %v872_v13  ;;  %v833_v29 = vsub.f32 %v827_v59, %v830_v4  ;;  %v876_v31 = vsub.f32 %v870_v10, %v873_v15  ;;  %v877_v32 = vsub.f32 %v871_v12, %v874_v16  ;;  %v1718_v4 = vld [vmem:[%s1613_s20 + $0x70] sm:$0xff]  ;;  %s2538_s26 = smov (!%p1627_p2, %s1140_s26), 7680  ;;  %1248 = sst [smem:[#allocation7]] (%p40_p5), %s1496_s28 }
  0x53   : > { %v1339_v37 = vpop.eup %1338  ;;  %v846_v38 = vadd.f32 1.0, %v1337_v35  ;;  %v315_v52 = vadd.s32 %v312_v6, %v1695_v22  ;;  %vm410_vm0 = vcmp.eq.f32.partialorder %v1708_v49, 1.0  ;;  %2488 = vst [vmem:[#allocation23_spill] sm:$0xff] %v1718_v4  ;;  %vm411_vm1 = vcmp.eq.f32.partialorder %v1714_v61, 1.0  ;;  %p271_p4 = scmp.lt.s32.totalorder %s1532_s13, 1  ;;  %1252 = sst [smem:[#allocation7 + $0x4]] (%p40_p5), %s1496_s28 }
  0x54   : > { %v1341_v40 = vpop.eup %1340  ;;  %v847_v41 = vadd.f32 1.0, %v1339_v37  ;;  %v913_v37 = vmax.f32 %v1656_v20, 0.0  ;;  %v2455_v15 = vmov 0.0   ;;  %vm412_vm2 = vcmp.eq.f32.partialorder %v1718_v4, 1.0  ;;  %1256 = sst [smem:[#allocation7 + $0x8]] (%p40_p5), %s1496_s28  ;;  %s1204_s27 = sld [smem:[#allocation7 + $0x4]] }
  0x55   : > { %v848_v42 = vadd.f32 1.0, %v1341_v40  ;;  %1354 = vlog2.f32 %v846_v38  ;;  %v1343_v43 = vpop.eup %1342  ;;  %v916_v38 = vmul.f32 %v1198_v19, %v1656_v20  ;;  %v314_v20 = vadd.s32 %v311_v17, %v1695_v22  ;;  %p2372_p6 = pnand %p271_p4, %p270_p3  ;;  %1249 = sst [smem:[#allocation7 + $0x1]] (%p40_p5), %s1496_s28 }
  0x56   : > { %1356 = vlog2.f32 %v847_v41  ;;  %v1345_v44 = vpop.eup %1344  ;;  %v890_v45 = vadd.f32 1.0, %v1343_v43  ;;  %v914_v41 = vmax.f32 %v1659_v21, 0.0  ;;  %v917_v43 = vmul.f32 %v1199_v27, %v1659_v21  ;;  %1253 = sst [smem:[#allocation7 + $0x5]] (%p40_p5), %s1496_s28  ;;  %s998_s3 = sld [smem:[#allocation7]] }
  0x57   : > { %1358 = vlog2.f32 %v848_v42  ;;  %v1347_v47 = vpop.eup %1346  ;;  %v891_v48 = vadd.f32 1.0, %v1345_v44  ;;  %v915_v42 = vmax.f32 %v1662_v25, 0.0  ;;  %v919_v57 = vsub.f32 %v913_v37, %v916_v38  ;;  %v1159_v37 = vld [vmem:[%s1607_s16 + $0x30] sm:$0xff]  ;;  %v1160_v38 = vld [vmem:[%s1607_s16 + $0x38] sm:$0xff]  ;;  %1257 = sst [smem:[#allocation7 + $0x9]] (%p40_p5), %s1496_s28  ;;  %s1208_s30 = sld [smem:[#allocation7 + $0x8]] }
  0x58   : > { %v892_v50 = vadd.f32 1.0, %v1347_v47  ;;  %1360 = vlog2.f32 %v890_v45  ;;  %v1349_v56 = vpop.eup %1348  ;;  %v316_v21 = vadd.s32 %v313_v23, %v1695_v22  ;;  %v920_v59 = vsub.f32 %v914_v41, %v917_v43  ;;  %1250 = sst [smem:[#allocation7 + $0x2]] (%p40_p5), %s1496_s28  ;;  %s1201_s4 = sld [smem:[#allocation7 + $0x1]] }
  0x59   : > { %1362 = vlog2.f32 %v891_v48  ;;  %v1351_v63 = vpop.eup %1350  ;;  %v934_v7 = vadd.f32 1.0, %v1349_v56  ;;  %v918_v48 = vmul.f32 %v1200_v33, %v1662_v25  ;;  %v318_v10 = vcvt.s32.f32 %v315_v52  ;;  %1254 = sst [smem:[#allocation7 + $0x6]] (%p40_p5), %s1496_s28  ;;  %s1205_s5 = sld [smem:[#allocation7 + $0x5]] }
  0x5a   : > { %1364 = vlog2.f32 %v892_v50  ;;  %v1353_v8 = vpop.eup %1352  ;;  %v935_v14 = vadd.f32 1.0, %v1351_v63  ;;  %v1724_v16 = vsel %vm410_vm0, 1.0, %v2455_v15  ;;  %v1735_v19 = vsel %vm412_vm2, 1.0, %v2455_v15  ;;  %1258 = sst [smem:[#allocation7 + $0xa]] (%p40_p5), %s1496_s28  ;;  %s1209_s7 = sld [smem:[#allocation7 + $0x9]] }
  0x5b   : > { %v936_v1 = vadd.f32 1.0, %v1353_v8  ;;  %1366 = vlog2.f32 %v934_v7  ;;  %v921_v62 = vsub.f32 %v915_v42, %v918_v48  ;;  %v317_v8 = vcvt.s32.f32 %v314_v20  ;;  %2489 = vst [vmem:[#allocation24_spill] sm:$0xff] %v1724_v16  ;;  %2491 = vst [vmem:[#allocation26_spill] sm:$0xff] %v1735_v19  ;;  %v1162_v42 = vld [vmem:[%s1607_s16 + $0x48] sm:$0xff]  ;;  %v1161_v48 = vld [vmem:[%s1607_s16 + $0x40] sm:$0xff]  ;;  %1251 = sst [smem:[#allocation7 + $0x3]] (%p40_p5), %s1496_s28 }
  0x5c   : > { %1368 = vlog2.f32 %v935_v14  ;;  %v423_v43 = vmin.f32 %v1159_v37, 40.0  ;;  %1255 = sst [smem:[#allocation7 + $0x7]] (%p40_p5), %s1496_s28  ;;  %s1202_s15 = sld [smem:[#allocation7 + $0x2]] }
  0x5d   : > { %1370 = vlog2.f32 %v936_v1  ;;  %v320_v23 = vmul.f32 0.33333334, %v317_v8  ;;  %1259 = sst [smem:[#allocation7 + $0xb]] (%p40_p5), %s1496_s28  ;;  %s1206_s18 = sld [smem:[#allocation7 + $0x6]] }
  0x5e   : > { %v426_v20 = vmul.f32 1.442695, %v423_v43  ;;  %p1280_p5 = scmp.eq.s32.totalorder %s1532_s13, 2 }
  0x5f   : > { %v1355_v0 = vpop.eup %1354 }
  0x60   : > { %v1357_v2 = vpop.eup %1356  ;;  %v850_v11 = vmul.f32 0.6931472, %v1355_v0  ;;  %v319_v0 = vcvt.s32.f32 %v316_v21  ;;  %1372 = vpow2.f32 %v426_v20 }
  0x61   : > { %v1359_v18 = vpop.eup %1358  ;;  %v852_v30 = vmul.f32 0.6931472, %v1357_v2  ;;  %v1730_v2 = vsel %vm411_vm1, 1.0, %v2455_v15 }
  0x62   : > { %v1361_v28 = vpop.eup %1360  ;;  %v854_v35 = vmul.f32 0.6931472, %v1359_v18  ;;  %v855_v44 = vadd.f32 %v850_v11, %v831_v9  ;;  %2490 = vst [vmem:[#allocation25_spill] sm:$0xff] %v1730_v2  ;;  %v321_v11 = vmul.f32 0.33333334, %v318_v10 }
  0x63   : > { %v1363_v34 = vpop.eup %1362  ;;  %v894_v36 = vmul.f32 0.6931472, %v1361_v28  ;;  %v856_v50 = vadd.f32 %v852_v30, %v832_v24  ;;  %v323_v30 = vfloor.f32 %v320_v23 }
  0x64   : > { %v1365_v39 = vpop.eup %1364  ;;  %v896_v40 = vmul.f32 0.6931472, %v1363_v34  ;;  %v857_v53 = vadd.f32 %v854_v35, %v833_v29 }
  0x65   : > { %v898_v45 = vmul.f32 0.6931472, %v1365_v39  ;;  %v899_v47 = vadd.f32 %v894_v36, %v875_v26  ;;  %v1367_v58 = vpop.eup %1366  ;;  %v322_v26 = vmul.f32 0.33333334, %v319_v0  ;;  %v326_v34 = vmul.f32 3.0, %v323_v30 }
  0x66   : > { %v900_v51 = vadd.f32 %v896_v40, %v876_v31  ;;  %v1369_v60 = vpop.eup %1368  ;;  %v938_v63 = vmul.f32 0.6931472, %v1367_v58  ;;  %v324_v31 = vfloor.f32 %v321_v11  ;;  %v1489_v58 = vmov 11.65625  }
  0x67   : > { %v901_v56 = vadd.f32 %v898_v45, %v877_v32  ;;  %v902_v25 = vadd.f32 %v899_v47, %v855_v44  ;;  %v1371_v3 = vpop.eup %1370  ;;  %v940_v7 = vmul.f32 0.6931472, %v1369_v60  ;;  %v325_v32 = vfloor.f32 %v322_v26  ;;  %v1163_v44 = vld [vmem:[%s1607_s16 + $0x50] sm:$0xff]  ;;  %v1164_v47 = vld [vmem:[%s1607_s16 + $0x58] sm:$0xff] }
  0x68   : > { %v903_v5 = vadd.f32 %v900_v51, %v856_v50  ;;  %v942_v13 = vmul.f32 0.6931472, %v1371_v3  ;;  %v943_v14 = vadd.f32 %v938_v63, %v919_v57  ;;  %v327_v35 = vmul.f32 3.0, %v324_v31 }
  0x69   : > { %v904_v12 = vadd.f32 %v901_v56, %v857_v53  ;;  %v944_v1 = vadd.f32 %v940_v7, %v920_v59  ;;  %v328_v36 = vmul.f32 3.0, %v325_v32  ;;  %v1742_v39 = vsub.f32 %v317_v8, %v326_v34 }
  0x6a   : > { %v945_v17 = vadd.f32 %v942_v13, %v921_v62  ;;  %v946_v18 = vadd.f32 %v943_v14, %v902_v25  ;;  %v1744_v40 = vsub.f32 %v318_v10, %v327_v35  ;;  %v424_v45 = vmin.f32 %v1160_v38, 40.0 }
  0x6b   : > { %v947_v6 = vadd.f32 %v944_v1, %v903_v5  ;;  %v1746_v41 = vsub.f32 %v319_v0, %v328_v36  ;;  %v442_v50 = vmin.f32 %v1162_v42, 40.0  ;;  %vm332_vm3 = vcmp.eq.f32.partialorder %v1742_v39, 1.0 }
  0x6c   : > { %v948_v9 = vadd.f32 %v945_v17, %v904_v12  ;;  %v949_v24 = vmul.f32 %v1724_v16, %v946_v18  ;;  %vm333_vm4 = vcmp.eq.f32.partialorder %v1744_v40, 1.0  ;;  %v443_v51 = vmin.f32 %v1163_v44, 40.0 }
  0x6d   : > { %v950_v27 = vmul.f32 %v1730_v2, %v947_v6  ;;  %vm334_vm5 = vcmp.eq.f32.partialorder %v1746_v41, 1.0  ;;  %v444_v52 = vmin.f32 %v1164_v47, 40.0  ;;  %v1759_v53 = vstv %s1145_s23 }
  0x6e   : > { %v951_v28 = vmul.f32 %v1735_v19, %v948_v9  ;;  %v1761_v56 = vstv %s1146_s24  ;;  %v425_v57 = vmin.f32 %v1161_v48, 40.0  ;;  %v428_v21 = vmul.f32 1.442695, %v424_v45  ;;  %s1203_s24 = sld [smem:[#allocation7 + $0x3]] }
  0x6f   : > { %v974_v29 = vadd.f32 %v950_v27, %v949_v24  ;;  %v335_v59 = vsel %vm332_vm3, 4.875, %v1489_v58  ;;  %v336_v60 = vsel %vm333_vm4, 4.875, %v1489_v58  ;;  %v337_v25 = vsel %vm334_vm5, 4.875, %v1489_v58 }
  0x70   : > { %v445_v62 = vmul.f32 1.442695, %v442_v50  ;;  %vm338_vm6 = vcmp.eq.f32.partialorder %v1742_v39, 0.0  ;;  %vm339_vm7 = vcmp.eq.f32.partialorder %v1744_v40, 0.0  ;;  %vm340_vm8 = vcmp.eq.f32.partialorder %v1746_v41, 0.0  ;;  %v1373_v50 = vpop.eup %1372 }
  0x71   : > { %v975_v33 = vadd.f32 %v974_v29, %v951_v28  ;;  %v447_v63 = vmul.f32 1.442695, %v443_v51  ;;  %vm364_vm9 = vcmp.eq.s32.totalorder %v1759_v53, 1  ;;  %v449_v3 = vmul.f32 1.442695, %v444_v52 }
  0x72   : > { %v1490_v5 = vmov 10.1875   ;;  %vm385_vm10 = vcmp.eq.s32.totalorder %v1761_v56, 1  ;;  %1374 = vpow2.f32 %v428_v21  ;;  %v430_v8 = vmul.f32 1.442695, %v425_v57 }
  0x73   : > { %976 = vadd.xlane.f32.xlu1 %v975_v33  ;;  %v344_v7 = vsel %vm332_vm3, 6.1875, %v1490_v5  ;;  %v341_v10 = vsel %vm338_vm6, 3.625, %v335_v59  ;;  %v342_v12 = vsel %vm339_vm7, 3.625, %v336_v60  ;;  %v343_v13 = vsel %vm340_vm8, 3.625, %v337_v25 }
  0x74   : > { %1376 = vpow2.f32 %v445_v62  ;;  %v345_v14 = vsel %vm333_vm4, 6.1875, %v1490_v5  ;;  %v346_v0 = vsel %vm334_vm5, 6.1875, %v1490_v5  ;;  %v1491_v1 = vmov 3.6875  }
  0x75   : > { %v350_v17 = vsel %vm332_vm3, 3.875, %v1491_v1  ;;  %1378 = vpow2.f32 %v447_v63  ;;  %v347_v18 = vsel %vm338_vm6, 2.8125, %v344_v7  ;;  %v1492_v6 = vmov 7.4375  }
  0x76   : > { %v356_v23 = vsel %vm332_vm3, 2.8125, %v1492_v6  ;;  %v357_v9 = vsel %vm333_vm4, 2.8125, %v1492_v6  ;;  %1380 = vpow2.f32 %v449_v3  ;;  %v351_v24 = vsel %vm333_vm4, 3.875, %v1491_v1 }
  0x77   : > { %v352_v11 = vsel %vm334_vm5, 3.875, %v1491_v1  ;;  %v358_v26 = vsel %vm334_vm5, 2.8125, %v1492_v6  ;;  %1382 = vpow2.f32 %v430_v8  ;;  %v348_v27 = vsel %vm339_vm7, 2.8125, %v345_v14  ;;  %v1165_v1 = vld [vmem:[%s1613_s20 + $0x30] sm:$0xff] }
  0x78   : > { %v349_v28 = vsel %vm340_vm8, 2.8125, %v346_v0  ;;  %v353_v29 = vsel %vm338_vm6, 1.875, %v350_v17  ;;  %v1493_v30 = vmov 4.125   ;;  %v359_v32 = vsel %vm338_vm6, 3.8125, %v356_v23  ;;  %v1168_v17 = vld [vmem:[%s1613_s20 + $0x48] sm:$0xff]  ;;  %v1169_v6 = vld [vmem:[%s1613_s20 + $0x50] sm:$0xff] }
  0x79   : > { %v371_v31 = vsel %vm332_vm3, 2.0, %v1493_v30  ;;  %v360_v33 = vsel %vm339_vm7, 3.8125, %v357_v9  ;;  %v1494_v34 = vmov 2.875   ;;  %v354_v37 = vsel %vm339_vm7, 1.875, %v351_v24  ;;  %v1166_v24 = vld [vmem:[%s1613_s20 + $0x38] sm:$0xff] }
  0x7a   : > { %v377_v35 = vsel %vm332_vm3, 3.75, %v1494_v34  ;;  %v378_v36 = vsel %vm333_vm4, 3.75, %v1494_v34  ;;  %v355_v38 = vsel %vm340_vm8, 1.875, %v352_v11  ;;  %v361_v42 = vsel %vm340_vm8, 3.8125, %v358_v26  ;;  %v1167_v11 = vld [vmem:[%s1613_s20 + $0x40] sm:$0xff]  ;;  %v1170_v26 = vld [vmem:[%s1613_s20 + $0x58] sm:$0xff] }
  0x7b   : > { %v379_v43 = vsel %vm334_vm5, 3.75, %v1494_v34  ;;  %v365_v44 = vsel %vm364_vm9, %v353_v29, %v341_v10  ;;  %v372_v45 = vsel %vm333_vm4, 2.0, %v1493_v30  ;;  %v373_v47 = vsel %vm334_vm5, 2.0, %v1493_v30 }
  0x7c   : > { %v374_v48 = vsel %vm338_vm6, 1.25, %v371_v31  ;;  %v368_v51 = vsel %vm364_vm9, %v359_v32, %v347_v18  ;;  %v369_v20 = vsel %vm364_vm9, %v360_v33, %v348_v27  ;;  %v380_v52 = vsel %vm338_vm6, 1.625, %v377_v35  ;;  %v1375_v21 = vpop.eup %1374  ;;  %v392_v33 = vld [vmem:[%s1607_s16] sm:$0xff] }
  0x7d   : > { %v381_v57 = vsel %vm339_vm7, 1.625, %v378_v36  ;;  %v366_v58 = vsel %vm364_vm9, %v354_v37, %v342_v12  ;;  %v370_v59 = vsel %vm364_vm9, %v361_v42, %v349_v28  ;;  %v382_v60 = vsel %vm340_vm8, 1.625, %v379_v43 }
  0x7e   : > { %v1377_v25 = vpop.eup %1376  ;;  %v367_v62 = vsel %vm364_vm9, %v355_v38, %v343_v13  ;;  %v375_v39 = vsel %vm339_vm7, 1.25, %v372_v45  ;;  %v376_v63 = vsel %vm340_vm8, 1.25, %v373_v47  ;;  %v386_v3 = vsel %vm385_vm10, %v374_v48, %v365_v44  ;;  %v399_v45 = vld [vmem:[%s1613_s20] sm:$0xff]  ;;  %v400_v47 = vld [vmem:[%s1613_s20 + $0x8] sm:$0xff] }
  0x7f   : > { %v1379_v5 = vpop.eup %1378  ;;  %v389_v7 = vsel %vm385_vm10, %v380_v52, %v368_v51  ;;  %v390_v53 = vsel %vm385_vm10, %v381_v57, %v369_v20  ;;  %v391_v40 = vsel %vm385_vm10, %v382_v60, %v370_v59  ;;  %v387_v10 = vsel %vm385_vm10, %v375_v39, %v366_v58 }
  0x80   : > { %v1381_v8 = vpop.eup %1380  ;;  %v388_v12 = vsel %vm385_vm10, %v376_v63, %v367_v62  ;;  %v432_v13 = vmul.f32 %v1373_v50, %v386_v3  ;;  %v451_v14 = vmul.f32 %v1377_v25, %v389_v7  ;;  %v452_v0 = vmul.f32 %v1379_v5, %v390_v53  ;;  %v1150_v62 = vld [vmem:[%s1613_s20 + $0x18] sm:$0xff] }
  0x81   : > { %v1383_v41 = vpop.eup %1382  ;;  %v453_v18 = vmul.f32 %v1381_v8, %v391_v40  ;;  %v433_v23 = vmul.f32 %v1375_v21, %v387_v10  ;;  %v461_v56 = vsel %vm410_vm0, %v1165_v1, 1.0  ;;  %v468_v28 = vsel %vm410_vm0, %v1168_v17, 1.0  ;;  %v401_v21 = vld [vmem:[%s1613_s20 + $0x10] sm:$0xff] }
  0x82   : > { %v434_v9 = vmul.f32 %v1383_v41, %v388_v12  ;;  %v1872_v27 = vsel %vm410_vm0, %v432_v13, 1.0  ;;  %v1880_v29 = vsel %vm410_vm0, %v451_v14, 1.0  ;;  %v1884_v30 = vsel %vm411_vm1, %v452_v0, 1.0  ;;  %v393_v41 = vld [vmem:[%s1607_s16 + $0x8] sm:$0xff]  ;;  %v394_v10 = vld [vmem:[%s1607_s16 + $0x10] sm:$0xff] }
  0x83   : > { %v1888_v31 = vsel %vm411_vm1, %v1169_v6, 1.0  ;;  %v471_v32 = vmul.f32 0.5, %v1872_v27  ;;  %v1894_v34 = vsel %vm412_vm2, %v453_v18, 1.0  ;;  %v1898_v35 = vsel %vm411_vm1, %v1166_v24, 1.0  ;;  %v1151_v6 = vld [vmem:[%s1613_s20 + $0x20] sm:$0xff] }
  0x84   : > { %v1902_v36 = vsel %vm412_vm2, %v1167_v11, 1.0  ;;  %v1906_v37 = vsel %vm412_vm2, %v1170_v26, 1.0  ;;  %v1910_v38 = vsel %vm411_vm1, %v433_v23, 1.0  ;;  %v1914_v42 = vsel %vm412_vm2, %v434_v9, 1.0  ;;  %v1152_v11 = vld [vmem:[%s1613_s20 + $0x28] sm:$0xff]  ;;  %s1210_s20 = sld [smem:[#allocation7 + $0xa]] }
  0x85   : > { %v489_v43 = vmul.f32 0.5, %v461_v56  ;;  %v490_v44 = vmul.f32 0.5, %v1898_v35  ;;  %v636_v48 = vmul.f32 %v468_v28, %v1880_v29  ;;  %v637_v50 = vmul.f32 %v1888_v31, %v1884_v30 }
  0x86   : > { %v1922_v51 = vsub.f32 %v392_v33, %v471_v32  ;;  %v491_v20 = vmul.f32 0.5, %v1902_v36  ;;  %v498_v52 = vmul.f32 0.5, %v468_v28  ;;  %v638_v57 = vmul.f32 %v1906_v37, %v1894_v34 }
  0x87   : > { %v1928_v58 = vadd.f32 %v471_v32, %v392_v33  ;;  %v639_v59 = vmul.f32 %v461_v56, %v1872_v27  ;;  %v640_v60 = vmul.f32 %v1898_v35, %v1910_v38  ;;  %v641_v25 = vmul.f32 %v1902_v36, %v1914_v42 }
  0x88   : > { %v472_v39 = vmul.f32 0.5, %v1910_v38  ;;  %v1937_v63 = vsub.f32 %v399_v45, %v489_v43  ;;  %v1939_v3 = vsub.f32 %v400_v47, %v490_v44  ;;  %v1941_v5 = vadd.f32 %v489_v43, %v399_v45 }
  0x89   : > { %v473_v7 = vmul.f32 0.5, %v1914_v42  ;;  %v642_v53 = vadd.f32 %v639_v59, %v636_v48  ;;  %v643_v8 = vadd.f32 %v640_v60, %v637_v50  ;;  %v644_v40 = vadd.f32 %v641_v25, %v638_v57  ;;  %v1147_v48 = vld [vmem:[%s1607_s16 + $0x18] sm:$0xff] }
  0x8a   : > { %v1946_v12 = vsub.f32 %v401_v21, %v491_v20  ;;  %v1948_v13 = vadd.f32 %v490_v44, %v400_v47  ;;  %v1950_v14 = vadd.f32 %v491_v20, %v401_v21  ;;  %v499_v0 = vmul.f32 0.5, %v1888_v31  ;;  %v1148_v21 = vld [vmem:[%s1607_s16 + $0x20] sm:$0xff] }
  0x8b   : > { %v500_v1 = vmul.f32 0.5, %v1906_v37  ;;  %v1954_v17 = vsub.f32 %v1150_v62, %v498_v52  ;;  %v1956_v18 = vadd.f32 %v1150_v62, %v498_v52  ;;  %1384 = vrcp.f32 %v642_v53  ;;  %v1149_v53 = vld [vmem:[%s1607_s16 + $0x28] sm:$0xff] }
  0x8c   : > { %v507_v23 = vmin.f32 %v1928_v58, %v1941_v5  ;;  %v510_v9 = vmax.f32 %v1922_v51, %v1937_v63  ;;  %v1963_v24 = vmul.f32 %v468_v28, %v461_v56  ;;  %1386 = vrcp.f32 %v643_v8 }
  0x8d   : > { %v1966_v26 = vsub.f32 %v393_v41, %v472_v39  ;;  %v1968_v32 = vadd.f32 %v472_v39, %v393_v41  ;;  %v1970_v33 = vadd.f32 %v473_v7, %v394_v10  ;;  %1388 = vrcp.f32 %v644_v40 }
  0x8e   : > { %v1972_v43 = vsub.f32 %v394_v10, %v473_v7  ;;  %v480_v44 = vmul.f32 0.5, %v1880_v29  ;;  %v627_v45 = vmul.f32 %v461_v56, %v1880_v29  ;;  %v630_v47 = vmul.f32 %v468_v28, %v1872_v27 }
  0x8f   : > { %2492 = vst [vmem:[#allocation27_spill] sm:$0xff] %v1968_v32  ;;  %2493 = vst [vmem:[#allocation28_spill] sm:$0xff] %v1970_v33  ;;  %v481_v50 = vmul.f32 0.5, %v1884_v30  ;;  %v1979_v20 = vsub.f32 %v1151_v6, %v499_v0  ;;  %v628_v52 = vmul.f32 %v1898_v35, %v1884_v30  ;;  %v631_v57 = vmul.f32 %v1888_v31, %v1910_v38 }
  0x90   : > { %v1986_v59 = vsub.f32 %v1152_v11, %v500_v1  ;;  %v1988_v60 = vadd.f32 %v1151_v6, %v499_v0  ;;  %v629_v56 = vmul.f32 %v1902_v36, %v1894_v34  ;;  %v632_v28 = vmul.f32 %v1906_v37, %v1914_v42 }
  0x91   : > { %v482_v25 = vmul.f32 0.5, %v1894_v34  ;;  %v508_v62 = vmin.f32 %v1968_v32, %v1948_v13  ;;  %v509_v39 = vmin.f32 %v1970_v33, %v1950_v14  ;;  %v511_v7 = vmax.f32 %v1966_v26, %v1939_v3 }
  0x92   : > { %v2002_v8 = vsub.f32 %v1147_v48, %v480_v44  ;;  %v2004_v40 = vadd.f32 %v1147_v48, %v480_v44  ;;  %v512_v41 = vmax.f32 %v1972_v43, %v1946_v12  ;;  %v633_v10 = vsub.f32 %v627_v45, %v630_v47 }
  0x93   : > { %v2008_v0 = vsub.f32 %v1148_v21, %v481_v50  ;;  %v2010_v6 = vadd.f32 %v1148_v21, %v481_v50  ;;  %v2012_v15 = vsub.f32 %v507_v23, %v510_v9  ;;  %v634_v4 = vsub.f32 %v628_v52, %v631_v57 }
  0x94   : > { %2494 = vst [vmem:[#allocation29_spill] sm:$0xff] %v2004_v40  ;;  %v2014_v19 = vadd.f32 %v1152_v11, %v500_v1  ;;  %v2018_v61 = vmul.f32 %v1888_v31, %v1898_v35  ;;  %v2022_v44 = vmul.f32 %v1906_v37, %v1902_v36  ;;  %v635_v48 = vsub.f32 %v629_v56, %v632_v28 }
  0x95   : > { %2495 = vst [vmem:[#allocation30_spill] sm:$0xff] %v2010_v6  ;;  %v1385_v49 = vpop.eup %1384  ;;  %v2024_v45 = vsub.f32 %v1149_v53, %v482_v25  ;;  %v2026_v47 = vadd.f32 %v1149_v53, %v482_v25  ;;  %v2028_v50 = vsub.f32 %v508_v62, %v511_v7  ;;  %v549_v1 = vmax.f32 %v1928_v58, %v1941_v5 }
  0x96   : > { %v1387_v23 = vpop.eup %1386  ;;  %v2032_v9 = vsub.f32 %v509_v39, %v512_v41  ;;  %v519_v31 = vmin.f32 %v2004_v40, %v1956_v18  ;;  %v522_v35 = vmax.f32 %v2002_v8, %v1954_v17  ;;  %v2038_v36 = vmul.f32 %v1385_v49, %v633_v10 }
  0x97   : > { %2496 = vst [vmem:[#allocation31_spill] sm:$0xff] %v2024_v45  ;;  %2497 = vst [vmem:[#allocation32_spill] sm:$0xff] %v2026_v47  ;;  %v1389_v37 = vpop.eup %1388  ;;  %v520_v52 = vmin.f32 %v2010_v6, %v1988_v60  ;;  %v523_v57 = vmax.f32 %v2008_v0, %v1979_v20  ;;  %v2045_v21 = vmul.f32 %v1387_v23, %v634_v4 }
  0x98   : > { %v534_v56 = vmul.f32 %v1880_v29, %v1872_v27  ;;  %v552_v28 = vmin.f32 %v1922_v51, %v1937_v63  ;;  %v2051_v25 = vmul.f32 %v1389_v37, %v635_v48  ;;  %v2054_v49 = vand.u32 2147483647, %v2038_v36 }
  0x99   : > { %v521_v39 = vmin.f32 %v2026_v47, %v2014_v19  ;;  %v524_v4 = vmax.f32 %v2024_v45, %v1986_v59  ;;  %v2062_v7 = vand.u32 2147483647, %v2045_v21  ;;  %v525_v29 = vsub.f32 %v519_v31, %v522_v35 }
  0x9a   : > { %2498 = vst [vmem:[#allocation33_spill] sm:$0xff] %v2051_v25  ;;  %v2066_v53 = vand.u32 2147483647, %v2051_v25  ;;  %vm654_vm11 = vcmp.gt.f32.partialorder %v2054_v49, 2.4142137  ;;  %v526_v41 = vsub.f32 %v520_v52, %v523_v57  ;;  %v535_v10 = vmul.f32 %v1884_v30, %v1910_v38 }
  0x9b   : > { %vm655_vm12 = vcmp.gt.f32.partialorder %v2062_v7, 2.4142137  ;;  %vm657_vm13 = vcmp.gt.f32.partialorder %v2054_v49, 0.41421357  ;;  %vm2075_vm15 = vmxor %vm654_vm11, %vm1495_vm14  ;;  %v550_v23 = vmax.f32 %v1968_v32, %v1948_v13  ;;  %vm658_vm4 = vcmp.gt.f32.partialorder %v2062_v7, 0.41421357 }
  0x9c   : > { %vm656_vm3 = vcmp.gt.f32.partialorder %v2066_v53, 2.4142137  ;;  %vm2085_vm5 = vmxor %vm655_vm12, %vm1495_vm14  ;;  %v675_v38 = vadd.f32 1.0, %v2054_v49  ;;  %v527_v31 = vsub.f32 %v521_v39, %v524_v4  ;;  %vm659_vm6 = vcmp.gt.f32.partialorder %v2066_v53, 0.41421357 }
  0x9d   : > { %vm2093_vm7 = vmxor %vm656_vm3, %vm1495_vm14  ;;  %v676_v37 = vadd.f32 1.0, %v2062_v7  ;;  %v677_v52 = vadd.f32 1.0, %v2066_v53  ;;  %v528_v57 = vmax.f32 %v525_v29, 0.0  ;;  %v551_v27 = vmax.f32 %v1970_v33, %v1950_v14 }
  0x9e   : > { %v558_v62 = vmax.f32 %v2004_v40, %v1956_v18  ;;  %v561_v39 = vmin.f32 %v2002_v8, %v1954_v17  ;;  %vm2109_vm8 = vmand %vm657_vm13, %vm2075_vm15  ;;  %v553_v29 = vmin.f32 %v1966_v26, %v1939_v3  ;;  %v559_v11 = vmax.f32 %v2010_v6, %v1988_v60 }
  0x9f   : > { %v562_v2 = vmin.f32 %v2008_v0, %v1979_v20  ;;  %vm2123_vm9 = vmand %vm658_vm4, %vm2085_vm5  ;;  %v678_v16 = vsel %vm2109_vm8, %v675_v38, 1.0  ;;  %v529_v22 = vmax.f32 %v526_v41, 0.0  ;;  %v554_v55 = vmin.f32 %v1972_v43, %v1946_v12 }
  0xa0   : > { %vm2135_vm10 = vmand %vm659_vm6, %vm2093_vm7  ;;  %v679_v30 = vsel %vm2123_vm9, %v676_v37, 1.0  ;;  %v681_v46 = vsel %vm654_vm11, %v2054_v49, %v678_v16  ;;  %v560_v41 = vmax.f32 %v2026_v47, %v2014_v19  ;;  %v563_v38 = vmin.f32 %v2024_v45, %v1986_v59 }
  0xa1   : > { %v680_v35 = vsel %vm2135_vm10, %v677_v52, 1.0  ;;  %v682_v33 = vsel %vm655_vm12, %v2062_v7, %v679_v30  ;;  %v555_v6 = vsub.f32 %v549_v1, %v552_v28  ;;  %v564_v32 = vsub.f32 %v558_v62, %v561_v39 }
  0xa2   : > { %v683_v37 = vsel %vm656_vm3, %v2066_v53, %v680_v35  ;;  %1390 = vrcp.f32 %v681_v46  ;;  %v556_v16 = vsub.f32 %v550_v23, %v553_v29  ;;  %v565_v40 = vsub.f32 %v559_v11, %v562_v2 }
  0xa3   : > { %v1171_v47 = vadd.f32 -1.0, %v2054_v49  ;;  %1392 = vrcp.f32 %v682_v33  ;;  %v536_v45 = vmul.f32 %v1894_v34, %v1914_v42  ;;  %v540_v52 = vadd.f32 %v1963_v24, %v534_v56 }
  0xa4   : > { %v1172_v25 = vadd.f32 -1.0, %v2062_v7  ;;  %1394 = vrcp.f32 %v683_v37  ;;  %v530_v1 = vmax.f32 %v527_v31, 0.0  ;;  %v557_v28 = vsub.f32 %v551_v27, %v554_v55 }
  0xa5   : > { %v566_v62 = vsub.f32 %v560_v41, %v563_v38  ;;  %v1173_v39 = vadd.f32 -1.0, %v2066_v53  ;;  %v2511_v46 = vmax.f32 %v2012_v15, 0.0  ;;  %v541_v2 = vadd.f32 %v2018_v61, %v535_v10 }
  0xa6   : > { %v567_v33 = vmul.f32 %v555_v6, %v555_v6  ;;  %v570_v11 = vmul.f32 %v564_v32, %v564_v32  ;;  %v2512_v34 = vmax.f32 %v2028_v50, 0.0  ;;  %v568_v24 = vmul.f32 %v556_v16, %v556_v16 }
  0xa7   : > { %v2164_v23 = vmul.f32 %v528_v57, %v2511_v46  ;;  %v571_v56 = vmul.f32 %v565_v40, %v565_v40  ;;  %v669_v55 = vsel %vm2109_vm8, %v1171_v47, %v2054_v49  ;;  %v542_v27 = vadd.f32 %v2022_v44, %v536_v45 }
  0xa8   : > { %v2169_v42 = vmul.f32 %v529_v22, %v2512_v34  ;;  %v670_v15 = vsel %vm2123_vm9, %v1172_v25, %v2062_v7  ;;  %v2513_v61 = vmax.f32 %v2032_v9, 0.0  ;;  %v569_v32 = vmul.f32 %v557_v28, %v557_v28 }
  0xa9   : > { %v572_v50 = vmul.f32 %v566_v62, %v566_v62  ;;  %v671_v22 = vsel %vm2135_vm10, %v1173_v39, %v2066_v53  ;;  %v543_v40 = vsub.f32 %v540_v52, %v2164_v23  ;;  %v573_v10 = vadd.f32 %v570_v11, %v567_v33 }
  0xaa   : > { %v2180_v6 = vmul.f32 %v530_v1, %v2513_v61  ;;  %v672_v44 = vsel %vm654_vm11, -1.0, %v669_v55  ;;  %v544_v45 = vsub.f32 %v541_v2, %v2169_v42  ;;  %v574_v47 = vadd.f32 %v571_v56, %v568_v24 }
  0xab   : > { %v673_v9 = vsel %vm655_vm12, -1.0, %v670_v15  ;;  %v674_v31 = vsel %vm656_vm3, -1.0, %v671_v22  ;;  %v575_v30 = vadd.f32 %v572_v50, %v569_v32  ;;  %v2196_v35 = vadd.f32 1e-07, %v543_v40 }
  0xac   : > { %v1391_v25 = vpop.eup %1390  ;;  %v545_v29 = vsub.f32 %v542_v27, %v2180_v6  ;;  %v2198_v37 = vadd.f32 1e-07, %v573_v10  ;;  %v2202_v52 = vadd.f32 1e-07, %v544_v45  ;;  %v2204_v1 = vadd.f32 1e-07, %v574_v47 }
  0xad   : > { %v1393_v57 = vpop.eup %1392  ;;  %v2194_v41 = vmul.f32 %v1391_v25, %v672_v44  ;;  %v2214_v2 = vadd.f32 1e-07, %v575_v30  ;;  %v579_v40 = vadd.f32 %v1941_v5, %v1937_v63  ;;  %v2228_v45 = vadd.f32 %v1948_v13, %v1939_v3  ;;  %v2238_v63 = vld [vmem:[%s1607_s16 + $0x68] sm:$0xff] }
  0xae   : > { %v1395_v38 = vpop.eup %1394  ;;  %v2200_v16 = vmul.f32 %v1393_v57, %v673_v9  ;;  %v2212_v46 = vadd.f32 1e-07, %v545_v29  ;;  %v609_v34 = vmul.f32 %v2198_v37, %v2196_v35  ;;  %v610_v56 = vmul.f32 %v2204_v1, %v2202_v52 }
  0xaf   : > { %v2206_v28 = vmul.f32 %v1395_v38, %v674_v31  ;;  %v696_v62 = vmul.f32 %v2194_v41, %v2194_v41  ;;  %v2231_v31 = vld [vmem:[%s1607_s16 + $0x60] sm:$0xff]  ;;  %v2235_v57 = vadd.f32 %v1950_v14, %v1946_v12  ;;  %v582_v5 = vsub.f32 %v579_v40, %v1922_v51  ;;  %v2244_v38 = vld [vmem:[%s1607_s16 + $0x70] sm:$0xff] }
  0xb0   : > { %v697_v39 = vmul.f32 %v2200_v16, %v2200_v16  ;;  %v611_v61 = vmul.f32 %v2214_v2, %v2212_v46  ;;  %1396 = vrcp.f32 %v609_v34  ;;  %v591_v30 = vadd.f32 %v1956_v18, %v1954_v17 }
  0xb1   : > { %v698_v33 = vmul.f32 %v2206_v28, %v2206_v28  ;;  %v699_v11 = vmul.f32 0.080537446, %v696_v62  ;;  %1398 = vrcp.f32 %v610_v56  ;;  %v2250_v34 = vadd.f32 %v1988_v60, %v1979_v20 }
  0xb2   : > { %v700_v24 = vmul.f32 0.080537446, %v697_v39  ;;  %1400 = vrcp.f32 %v611_v61  ;;  %v790_v14 = vand.u32 2147483647, %v2231_v31  ;;  %v791_v18 = vand.u32 2147483647, %v2238_v63 }
  0xb3   : > { %v701_v55 = vmul.f32 0.080537446, %v698_v33  ;;  %v1174_v27 = vadd.f32 -0.13877685, %v699_v11  ;;  %v583_v11 = vsub.f32 %v2228_v45, %v1966_v26  ;;  %v792_v60 = vand.u32 2147483647, %v2244_v38 }
  0xb4   : > { %v1175_v15 = vadd.f32 -0.13877685, %v700_v24  ;;  %v2514_v24 = vmov 0.0   ;;  %v794_v40 = vsub.f32 0.0, %v791_v18 }
  0xb5   : > { %v1176_v32 = vadd.f32 -0.13877685, %v701_v55  ;;  %v705_v50 = vmul.f32 %v1174_v27, %v696_v62  ;;  %v690_v51 = vsel %vm2109_vm8, 0.7853982, %v2514_v24  ;;  %v584_v55 = vsub.f32 %v2235_v57, %v1972_v43 }
  0xb6   : > { %v706_v22 = vmul.f32 %v1175_v15, %v697_v39  ;;  %v691_v27 = vsel %vm2123_vm9, 0.7853982, %v2514_v24  ;;  %v585_v15 = vsub.f32 %v582_v5, %v1928_v58  ;;  %v692_v4 = vsel %vm2135_vm10, 0.7853982, %v2514_v24  ;;  %v2515_v5 = vld [vmem:[#allocation33_spill] sm:$0xff] }
  0xb7   : > { %v707_v10 = vmul.f32 %v1176_v32, %v698_v33  ;;  %v708_v44 = vadd.f32 0.19977711, %v705_v50  ;;  %v593_v43 = vadd.f32 %v2014_v19, %v1986_v59  ;;  %v693_v48 = vsel %vm654_vm11, 1.5707964, %v690_v51 }
  0xb8   : > { %v709_v47 = vadd.f32 0.19977711, %v706_v22  ;;  %v793_v50 = vsub.f32 0.0, %v790_v14  ;;  %v694_v54 = vsel %vm655_vm12, 1.5707964, %v691_v27  ;;  %v795_v49 = vsub.f32 0.0, %v792_v60 }
  0xb9   : > { %v710_v9 = vadd.f32 0.19977711, %v707_v10  ;;  %v711_v25 = vmul.f32 %v708_v44, %v696_v62  ;;  %v594_v10 = vsub.f32 %v591_v30, %v2002_v8  ;;  %v695_v19 = vsel %vm656_vm3, 1.5707964, %v692_v4  ;;  %v2516_v30 = vld [vmem:[#allocation31_spill] sm:$0xff]  ;;  %v2519_v4 = vld [vmem:[#allocation30_spill] sm:$0xff] }
  0xba   : > { %v712_v29 = vmul.f32 %v709_v47, %v697_v39  ;;  %v2268_v32 = vpop.eup %1396  ;;  %v595_v47 = vsub.f32 %v2250_v34, %v2008_v0  ;;  %vm729_vm11 = vcmp.lt.f32.partialorder %v2038_v36, 0.0  ;;  %v796_v53 = vmul.f32 1.442695, %v793_v50  ;;  %v2518_v60 = vld [vmem:[#allocation27_spill] sm:$0xff] }
  0xbb   : > { %v713_v3 = vmul.f32 %v710_v9, %v698_v33  ;;  %v1177_v13 = vadd.f32 -0.3333295, %v711_v25  ;;  %v2275_v22 = vpop.eup %1398  ;;  %v615_v7 = vmul.f32 %v2268_v32, %v2198_v37  ;;  %vm730_vm12 = vcmp.lt.f32.partialorder %v2045_v21, 0.0 }
  0xbc   : > { %v1178_v12 = vadd.f32 -0.3333295, %v712_v29  ;;  %v2285_v44 = vpop.eup %1400  ;;  %v616_v8 = vmul.f32 %v2275_v22, %v2204_v1  ;;  %v798_v29 = vmul.f32 1.442695, %v794_v40  ;;  %vm731_vm13 = vcmp.lt.f32.partialorder %v2515_v5, 0.0 }
  0xbd   : > { %v1179_v56 = vadd.f32 -0.3333295, %v713_v3  ;;  %v717_v17 = vmul.f32 %v1177_v13, %v696_v62  ;;  %v617_v0 = vmul.f32 %v2285_v44, %v2214_v2  ;;  %v596_v3 = vsub.f32 %v593_v43, %v2516_v30  ;;  %v2517_v13 = vld [vmem:[#allocation29_spill] sm:$0xff]  ;;  %v2520_v43 = vld [vmem:[#allocation28_spill] sm:$0xff] }
  0xbe   : > { %v718_v20 = vmul.f32 %v1178_v12, %v697_v39  ;;  %v597_v1 = vsub.f32 %v594_v10, %v2517_v13  ;;  %v2302_v36 = vmul.f32 %v615_v7, %v2164_v23  ;;  %1402 = vpow2.f32 %v796_v53 }
  0xbf   : > { %v719_v61 = vmul.f32 %v1179_v56, %v698_v33  ;;  %v720_v62 = vmul.f32 %v717_v17, %v2194_v41  ;;  %v2305_v51 = vmul.f32 %v616_v8, %v2169_v42  ;;  %1404 = vpow2.f32 %v798_v29  ;;  %v2523_v29 = vld [vmem:[#allocation18_spill] sm:$0xff] }
  0xc0   : > { %v721_v39 = vmul.f32 %v718_v20, %v2200_v16  ;;  %v2308_v17 = vmul.f32 %v617_v0, %v2180_v6  ;;  %v586_v23 = vsub.f32 %v583_v11, %v2518_v60  ;;  %v292_v0 = vmul.u32 128, %v2523_v29 }
  0xc1   : > { %v722_v58 = vmul.f32 %v719_v61, %v2206_v28  ;;  %v723_v33 = vadd.f32 %v720_v62, %v2194_v41  ;;  %v598_v61 = vsub.f32 %v595_v47, %v2519_v4  ;;  %v294_v5 = vstv %s290_s25 }
  0xc2   : > { %v724_v59 = vadd.f32 %v721_v39, %v2200_v16  ;;  %v2521_v39 = vld [vmem:[#allocation32_spill] sm:$0xff]  ;;  %v589_v26 = vmul.f32 %v586_v23, %v586_v23  ;;  %v622_v30 = vmul.f32 %v2275_v22, %v2202_v52 }
  0xc3   : > { %v725_v9 = vadd.f32 %v722_v58, %v2206_v28  ;;  %v726_v41 = vadd.f32 %v723_v33, %v693_v48  ;;  %v800_v28 = vmul.f32 1.442695, %v795_v49  ;;  %v587_v48 = vsub.f32 %v584_v55, %v2520_v43 }
  0xc4   : > { %v727_v25 = vadd.f32 %v724_v59, %v694_v54  ;;  %v599_v50 = vsub.f32 %v596_v3, %v2521_v39  ;;  %v588_v54 = vmul.f32 %v585_v15, %v585_v15  ;;  %v600_v58 = vmul.f32 %v597_v1, %v597_v1  ;;  %v2524_v3 = vld [vmem:[#allocation19_spill] sm:$0xff] }
  0xc5   : > { %v728_v16 = vadd.f32 %v725_v9, %v695_v19  ;;  %v732_v57 = vsub.f32 0.0, %v726_v41  ;;  %1406 = vpow2.f32 %v800_v28  ;;  %v601_v45 = vmul.f32 %v598_v61, %v598_v61 }
  0xc6   : > { %v733_v37 = vsub.f32 0.0, %v727_v25  ;;  %v590_v19 = vmul.f32 %v587_v48, %v587_v48  ;;  %v602_v59 = vmul.f32 %v599_v50, %v599_v50  ;;  %v603_v49 = vadd.f32 %v600_v58, %v588_v54 }
  0xc7   : > { %v734_v34 = vsub.f32 0.0, %v728_v16  ;;  %v735_v12 = vsel %vm729_vm11, %v732_v57, %v726_v41  ;;  %v604_v7 = vadd.f32 %v601_v45, %v589_v26  ;;  %v621_v57 = vmul.f32 %v2268_v32, %v2196_v35 }
  0xc8   : > { %v736_v14 = vsel %vm730_vm12, %v733_v37, %v727_v25  ;;  %v738_v21 = vmul.f32 0.40528473, %v735_v12  ;;  %v1403_v55 = vpop.eup %1402  ;;  %v605_v9 = vadd.f32 %v602_v59, %v590_v19  ;;  %v606_v8 = vmul.f32 0.25, %v603_v49  ;;  %v2522_v25 = vld [vmem:[#allocation17_spill] sm:$0xff] }
  0xc9   : > { %v737_v2 = vsel %vm731_vm13, %v734_v34, %v728_v16  ;;  %v739_v56 = vmul.f32 0.40528473, %v736_v14  ;;  %v1405_v47 = vpop.eup %1404  ;;  %v802_v41 = vadd.f32 1.0, %v1403_v55  ;;  %v291_v53 = vmul.u32 128, %v2522_v25 }
  0xca   : > { %v740_v18 = vmul.f32 0.40528473, %v737_v2  ;;  %v741_v27 = vmul.f32 %v738_v21, %v735_v12  ;;  %v803_v16 = vadd.f32 1.0, %v1405_v47  ;;  %v607_v28 = vmul.f32 0.25, %v604_v7 }
  0xcb   : > { %v742_v20 = vmul.f32 %v739_v56, %v736_v14  ;;  %v293_v13 = vmul.u32 128, %v2524_v3  ;;  %v608_v1 = vmul.f32 0.25, %v605_v9  ;;  %v623_v34 = vmul.f32 %v2285_v44, %v2212_v46  ;;  %v2525_v46 = vld [vmem:[#allocation20_spill] sm:$0xff] }
  0xcc   : > { %v743_v62 = vmul.f32 %v740_v18, %v737_v2  ;;  %v744_v42 = vsub.f32 %v741_v27, %v2302_v36  ;;  %v295_v35 = vadd.s32 %v294_v5, %v291_v53  ;;  %v624_v14 = vmul.f32 %v621_v57, %v606_v8  ;;  %v2530_v57 = vld [vmem:[#allocation26_spill] sm:$0xff] }
  0xcd   : > { %v745_v6 = vsub.f32 %v742_v20, %v2305_v51  ;;  %v296_v2 = vadd.s32 %v294_v5, %v292_v0  ;;  %v625_v18 = vmul.f32 %v622_v30, %v607_v28  ;;  %v297_v22 = vadd.s32 %v294_v5, %v293_v13 }
  0xce   : > { %v746_v33 = vsub.f32 %v743_v62, %v2308_v17  ;;  %v747_v40 = vadd.f32 1.0000001, %v744_v42  ;;  %v626_v60 = vmul.f32 %v623_v34, %v608_v1  ;;  %v298_v44 = vadd.s32 %v295_v35, %v2525_v46 }
  0xcf   : > { %v748_v10 = vadd.f32 1.0000001, %v745_v6  ;;  %v1407_v15 = vpop.eup %1406  ;;  %v299_v48 = vadd.s32 %v296_v2, %v2525_v46  ;;  %v301_v39 = vstv %s2538_s26  ;;  %v300_v6 = vadd.s32 %v297_v22, %v2525_v46 }
  0xd0   : > { %v749_v11 = vadd.f32 1.0000001, %v746_v33  ;;  %1408 = vrcp.f32 %v747_v40  ;;  %v804_v37 = vadd.f32 1.0, %v1407_v15  ;;  %v2526_v33 = vld [vmem:[#allocation24_spill] sm:$0xff]  ;;  %v2527_v40 = vld [vmem:[#allocation25_spill] sm:$0xff]  ;;  %vm302_vm14 = vcmp.lt.s32.totalorder %v298_v44, %v301_v39 }
  0xd1   : > { %1410 = vrcp.f32 %v748_v10  ;;  %v963_v10 = vadd.f32 %v2527_v40, %v2526_v33  ;;  %vm303_vm15 = vcmp.lt.s32.totalorder %v299_v48, %v301_v39  ;;  %vm304_vm3 = vcmp.lt.s32.totalorder %v300_v6, %v301_v39 }
  0xd2   : > { %1412 = vrcp.f32 %v749_v11  ;;  %v1142_v34 = vsel %vm302_vm14, 1.0, %v2514_v24 }
  0xd3   : > { %1414 = vlog2.f32 %v802_v41 }
  0xd4   : > { %1416 = vlog2.f32 %v803_v16 }
  0xd5   : > { %1418 = vlog2.f32 %v804_v37 }
  0xda   : > { %v1409_v12 = vpop.eup %1408 }
  0xdb   : > { %v1411_v32 = vpop.eup %1410  ;;  %v753_v21 = vmul.f32 %v1409_v12, %v741_v27 }
  0xdc   : > { %v1413_v56 = vpop.eup %1412  ;;  %v754_v52 = vmul.f32 %v1411_v32, %v742_v20 }
  0xdd   : > { %v755_v23 = vmul.f32 %v1413_v56, %v743_v62  ;;  %v756_v4 = vmul.f32 %v753_v21, %v741_v27  ;;  %v781_v27 = vmax.f32 %v2231_v31, 0.0  ;;  %v964_v21 = vadd.f32 %v2530_v57, %v963_v10 }
  0xde   : > { %v757_v61 = vmul.f32 %v754_v52, %v742_v20  ;;  %v782_v20 = vmax.f32 %v2238_v63, 0.0 }
  0xdf   : > { %v758_v42 = vmul.f32 %v755_v23, %v743_v62  ;;  %v759_v43 = vadd.f32 %v756_v4, %v624_v14  ;;  %v1415_v62 = vpop.eup %1414 }
  0xe0   : > { %v760_v50 = vadd.f32 %v757_v61, %v625_v18  ;;  %v1417_v59 = vpop.eup %1416  ;;  %v806_v16 = vmul.f32 0.6931472, %v1415_v62 }
  0xe1   : > { %v761_v54 = vadd.f32 %v758_v42, %v626_v60  ;;  %v762_v58 = vsub.f32 %v2302_v36, %v759_v43  ;;  %v783_v36 = vmax.f32 %v2244_v38, 0.0  ;;  %v1419_v47 = vpop.eup %1418  ;;  %v808_v28 = vmul.f32 0.6931472, %v1417_v59 }
  0xe2   : > { %v763_v26 = vsub.f32 %v2305_v51, %v760_v50  ;;  %v810_v1 = vmul.f32 0.6931472, %v1419_v47 }
  0xe3   : > { %v764_v45 = vsub.f32 %v2308_v17, %v761_v54  ;;  %v765_v11 = vsub.f32 1.0, %v762_v58  ;;  %v771_v19 = vmax.f32 %v762_v58, 0.0 }
  0xe4   : > { %v766_v55 = vsub.f32 1.0, %v763_v26  ;;  %v772_v49 = vmax.f32 %v763_v26, 0.0 }
  0xe5   : > { %v767_v15 = vsub.f32 1.0, %v764_v45  ;;  %v768_v51 = vmul.f32 %v2526_v33, %v765_v11  ;;  %v773_v7 = vmax.f32 %v764_v45, 0.0  ;;  %v774_v41 = vsel %vm410_vm0, %v771_v19, 0.0 }
  0xe6   : > { %v769_v8 = vmul.f32 %v2527_v40, %v766_v55  ;;  %v775_v25 = vsel %vm411_vm1, %v772_v49, 0.0  ;;  %v784_v53 = vmul.f32 %v2231_v31, %v774_v41  ;;  %v1143_v31 = vsel %vm303_vm15, 1.0, %v2514_v24 }
  0xe7   : > { %v770_v29 = vmul.f32 %v2530_v57, %v767_v15  ;;  %v776_v5 = vsel %vm412_vm2, %v773_v7, 0.0  ;;  %v785_v37 = vmul.f32 %v2238_v63, %v775_v25  ;;  %v1144_v63 = vsel %vm304_vm3, 1.0, %v2514_v24 }
  0xe8   : > { %v952_v30 = vadd.f32 %v769_v8, %v768_v51  ;;  %v786_v3 = vmul.f32 %v2244_v38, %v776_v5  ;;  %v787_v13 = vsub.f32 %v781_v27, %v784_v53 }
  0xe9   : > { %v788_v12 = vsub.f32 %v782_v20, %v785_v37 }
  0xea   : > { %v953_v35 = vadd.f32 %v952_v30, %v770_v29  ;;  %v789_v32 = vsub.f32 %v783_v36, %v786_v3  ;;  %v811_v14 = vadd.f32 %v806_v16, %v787_v13 }
  0xeb   : > { %v812_v38 = vadd.f32 %v808_v28, %v788_v12 }
  0xec   : > { %954 = vadd.xlane.f32.xlu0 %v953_v35  ;;  %v813_v2 = vadd.f32 %v810_v1, %v789_v32  ;;  %v814_v56 = vmul.f32 %v1142_v34, %v811_v14 }
  0xed   : > { %v815_v18 = vmul.f32 %v1143_v31, %v812_v38 }
  0xee   : > { %v816_v52 = vmul.f32 %v1144_v63, %v813_v2 }
  0xef   : > { %v985_v22 = vadd.f32 %v815_v18, %v814_v56 }
  0xf0   : > { %965 = vadd.xlane.f32.xlu0 %v964_v21 }
  0xf1   : > { %v986_v24 = vadd.f32 %v985_v22, %v816_v52 }
  0xf3   : > { %987 = vadd.xlane.f32.xlu1 %v986_v24 }
 0x100   : > { %v977_v60 = vpop.xlane.xlu1 %976 }
 0x101   : > { %v978_v23 = vrot.slane %v977_v60, 4 }
 0x103   : > { %v979_v4 = vadd.f32 %v978_v23, %v977_v60 }
 0x105   : > { %v980_v42 = vrot.slane %v979_v4, 2 }
 0x107   : > { %v981_v33 = vadd.f32 %v980_v42, %v979_v4 }
 0x109   : > { %v982_v45 = vrot.slane %v981_v33, 1 }
 0x10b   : > { %v983_v55 = vadd.f32 %v982_v45, %v981_v33 }
 0x179   : > { %v955_v61 = vpop.xlane.xlu0 %954 }
 0x17a   : > { %v956_v46 = vrot.slane %v955_v61, 4 }
 0x17c   : > { %v957_v44 = vadd.f32 %v956_v46, %v955_v61 }
 0x17d   : > { %v966_v43 = vpop.xlane.xlu0 %965 }
 0x17e   : > { %v958_v48 = vrot.slane %v957_v44, 2  ;;  %v967_v39 = vrot.slane %v966_v43, 4 }
 0x180   : > { %v968_v50 = vadd.f32 %v967_v39, %v966_v43  ;;  %v988_v6 = vpop.xlane.xlu1 %987  ;;  %v959_v54 = vadd.f32 %v958_v48, %v957_v44 }
 0x181   : > { %v989_v58 = vrot.slane %v988_v6, 4 }
 0x182   : > { %v969_v40 = vrot.slane %v968_v50, 2  ;;  %v960_v10 = vrot.slane %v959_v54, 1 }
 0x183   : > { %v990_v26 = vadd.f32 %v989_v58, %v988_v6 }
 0x184   : > { %v970_v27 = vadd.f32 %v969_v40, %v968_v50  ;;  %v961_v20 = vadd.f32 %v960_v10, %v959_v54 }
 0x185   : > { %v991_v62 = vrot.slane %v990_v26, 2 }
 0x186   : > { %1221 = vpush %v961_v20  ;;  %v971_v11 = vrot.slane %v970_v27, 1 }
 0x187   : > { %v992_v19 = vadd.f32 %v991_v62, %v990_v26 }
 0x188   : > { %v972_v59 = vadd.f32 %v971_v11, %v970_v27 }
 0x189   : > { %v993_v49 = vrot.slane %v992_v19, 1 }
 0x18a   : > { %1223 = vpush %v972_v59 }
 0x18b   : > { %1225 = vpush %v983_v55  ;;  %v994_v36 = vadd.f32 %v993_v49, %v992_v19 }
 0x18d   : > { %1227 = vpush %v994_v36 }
 0x1b7   : > { %s1222_s21 = spop %1221 }
 0x1b8   : > { %s999_s22 = sadd.f32 %s1222_s21, %s998_s3  ;;  %s1207_s3 = sld [smem:[#allocation7 + $0x7]] }
 0x1b9   : > { %s1017_s6 = sadd.f32 %s1222_s21, %s1204_s27 }
 0x1ba   : > { %1261 = sst [smem:[#allocation7]] (!%p2372_p6), %s999_s22 }
 0x1bb   : > { %1266 = sst [smem:[#allocation7 + $0x4]] (!%p1623_p1), %s1017_s6  ;;  %s1224_s8 = spop %1223 }
 0x1bc   : > { %s1035_s9 = sadd.f32 %s1222_s21, %s1208_s30  ;;  %s1226_s26 = spop %1225 }
 0x1bd   : > { %s1003_s16 = sadd.f32 %s1224_s8, %s1201_s4  ;;  %s1211_s30 = sld [smem:[#allocation7 + $0xb]] }
 0x1be   : > { %1271 = sst [smem:[#allocation7 + $0x8]] (!%p1627_p2), %s1035_s9  ;;  %s1228_s4 = spop %1227 }
 0x1bf   : > { %1262 = sst [smem:[#allocation7 + $0x1]] (!%p2372_p6), %s1003_s16  ;;  %s1420_s9 = scalar_lea.hbm %s2454_s2, 16 }
 0x1c0   : > { %s1021_s23 = sadd.f32 %s1224_s8, %s1205_s5  ;;  %p1421_p7 = scmp.ne.s32.totalorder %s2454_s2, %s1420_s9 }
 0x1c1   : > { %s1039_s25 = sadd.f32 %s1224_s8, %s1209_s7  ;;  %p1426_p10 = scmp.lt.u32.totalorder %s1420_s9, %s2454_s2 }
 0x1c2   : > { %1267 = sst [smem:[#allocation7 + $0x5]] (!%p1623_p1), %s1021_s23  ;;  %p1422_p8 = pnand %p1421_p7, %p1280_p5 }
 0x1c3   : > { %1272 = sst [smem:[#allocation7 + $0x9]] (!%p1627_p2), %s1039_s25 }
 0x1c4   : > { %s1007_s28 = sadd.f32 %s1226_s26, %s1202_s15  ;;  %p1423_p9 = pneg %p1422_p8 }
 0x1c5   : > { %s1025_s27 = sadd.f32 %s1226_s26, %s1206_s18 }
 0x1c6   : > { %1263 = sst [smem:[#allocation7 + $0x2]] (!%p2372_p6), %s1007_s28  ;;  %p1428_p11 = pnand %p1426_p10, %p1423_p9 }
 0x1c7   : > { %1268 = sst [smem:[#allocation7 + $0x6]] (!%p1623_p1), %s1025_s27 }
 0x1c8   : > { %s1043_s21 = sadd.f32 %s1226_s26, %s1210_s20 }
 0x1c9   : > { %s1011_s22 = sadd.f32 %s1228_s4, %s1203_s24 }
 0x1ca   : > { %1273 = sst [smem:[#allocation7 + $0xa]] (!%p1627_p2), %s1043_s21 }
 0x1cb   : > { %1264 = sst [smem:[#allocation7 + $0x3]] (!%p2372_p6), %s1011_s22 }
 0x1cc   : > { %s1029_s5 = sadd.f32 %s1228_s4, %s1207_s3 }
 0x1cd   : > { %s1047_s6 = sadd.f32 %s1228_s4, %s1211_s30 }
 0x1ce   : > { %1269 = sst [smem:[#allocation7 + $0x7]] (!%p1623_p1), %s1029_s5 }
 0x1cf   : > { %1274 = sst [smem:[#allocation7 + $0xb]] (!%p1627_p2), %s1047_s6 }
 0x1d0   : > { %1431 = shalt.err (!%p1428_p11)
}
 0x1d1   : > { %s1497_s12 = smov [#allocation7]  }
 0x1d2   : > { %1276 = dma.smem_to_hbm (%p1280_p5), %s1497_s12, 16, %s2454_s2, [#allocation4]  }
 0x1d3   : > { %1457 = dma.done.wait (%p1280_p5), [#allocation4], 16  }
 0x1d4   : > { %1459 = vsyncadd (%p1280_p5), [#allocation4], 4294967280 }
 0x1d5   : > { %1063 = sfence }
 0x1d6 PF: > { %p16_p12 = scmp.ge.s32.totalorder %s1535_s14, 5   ;;  %s2533_s9 = smov %s1466_s10 }
 0x1d7   : > { %s2534_s10 = smov %s1470_s11  ;;  %s2535_s11 = smov %s1545_s17 }
 0x1d8   : > { %s2536_s12 = smov %s1535_s14  ;;  %18 = sbr.rel (!%p16_p12) target bundleno = 6 (0x6), region = 142 }
 0x1df   :  { %1069 = vsyncpa [#allocation3], 1 }
 0x1e0   :  { %1071 = vsyncpa [#allocation3 + $0x1], 1 }
 0x1e1   :  { %1072 = vsyncpa [#allocation6], 1 }
 0x1e2   :  { %1074 = vsyncpa [#allocation6 + $0x1], 1 }
 0x1e3   :  { %1075 = vsyncpa [#allocation4], 1 }
 0x1e4   :  { %1077 = vsyncpa [#allocation4 + $0x1], 1 }

</bundles_post_ra>
